<compile_context>
chip_gen: v5e
topology: v5e:2x2
jax: 0.10.0
libtpu: 0.0.40
codegen_flags: <defaults>
</compile_context>

<pallas_src>
import jax
import jax.numpy as jnp
from jax.experimental import pallas as pl
from jax.experimental.pallas import tpu as pltpu


def _round_up(x, m):
    return (x + m - 1) // m * m


# --------------------------------------------------------------------------
# Host-side weight preparation (done once, independent of the input).
# --------------------------------------------------------------------------
def _build_stage_operands(w_hwio, bias, h_in, w_in, c_in, k_in_pad):
    """Fused banded conv matrix + bias row for one [conv3x3 -> maxpool3] stage.

    Activation layout inside the kernel: rows = image rows, lanes = w*c_in,
    zero-padded to k_in_pad lanes.  The banded matrix consumes the (ho, 3*k_in_pad)
    im2col slab (dy row-windows at lane offsets 0, k_in_pad, 2*k_in_pad) in ONE
    matmul and emits the three max-pool-x residue groups at 128-aligned lane
    offsets 0, wpc_pad, 2*wpc_pad (pad columns are zero).
    """
    c_out = w_hwio.shape[-1]
    ho, wo = h_in - 2, w_in - 2
    hp, wp = ho // 3, wo // 3
    assert hp >= 1 and wp >= 1, "spatial size too small for conv3x3 + maxpool3"
    wpc = wp * c_out
    wpc_pad = _round_up(wpc, 128)

    wband = jnp.zeros((3 * k_in_pad, 3 * wpc_pad), jnp.float32)
    wprime = jnp.arange(w_in)   # input x position
    jcol = jnp.arange(wp)       # pooled output x position
    for dy in range(3):
        for px in range(3):
            dx = wprime[:, None] - (3 * jcol[None, :] + px)          # (w_in, wp)
            valid = (dx >= 0) & (dx <= 2)
            dxc = jnp.clip(dx, 0, 2)
            blk = w_hwio[dy][dxc]                                    # (w_in, wp, c_in, c_out)
            blk = blk * valid[:, :, None, None].astype(w_hwio.dtype)
            band = jnp.transpose(blk, (0, 2, 1, 3)).reshape(w_in * c_in, wpc)
            wband = wband.at[dy * k_in_pad: dy * k_in_pad + w_in * c_in,
                             px * wpc_pad: px * wpc_pad + wpc].set(band.astype(jnp.float32))

    brow = jnp.zeros((1, wpc_pad), jnp.float32)
    brow = brow.at[0, :wpc].set(jnp.tile(bias.astype(jnp.float32), wp))

    meta = (h_in, ho, hp, k_in_pad, wpc_pad)
    return meta, wband, brow, hp, wp, c_out, wpc_pad


def _build_mlp_operands(mlp_ws, mlp_bs, c_last, hp, wp, wpc_pad):
    """First Linear: permute rows from torch's per-sample (C,H,W) flatten order
    into the kernel's (1, hp*wpc_pad) feature-row layout (pooled row r at lane
    offset r*wpc_pad, lanes within a row = (w, c)); pad-lane rows are zero.
    Remaining layers pass through unchanged."""
    hidden = mlp_ws[0].shape[1]
    w1_big = jnp.zeros((hp * wpc_pad, hidden), jnp.float32)
    for r in range(hp):
        idx = (jnp.arange(c_last)[None, :] * (hp * wp)
               + r * wp + jnp.arange(wp)[:, None]).reshape(wp * c_last)
        w1_big = w1_big.at[r * wpc_pad: r * wpc_pad + wp * c_last, :].set(
            mlp_ws[0][idx].astype(jnp.float32))
    ops = [w1_big, mlp_bs[0].reshape(1, -1).astype(jnp.float32)]
    for w, b in zip(mlp_ws[1:], mlp_bs[1:]):
        ops.extend([w.astype(jnp.float32), b.reshape(1, -1).astype(jnp.float32)])
    return ops


# --------------------------------------------------------------------------
# The single fused kernel: conv/pool stages + flatten + MLP, all VMEM-resident.
# One grid step == one batch element.
# --------------------------------------------------------------------------
def _make_fused_kernel(stage_meta, n_mlp_layers):
    n_stage = len(stage_meta)

    def kernel(*refs):
        x_ref = refs[0]                                      # (H, K0_pad), this sample
        pos = 1
        stage_refs = []
        for _ in range(n_stage):
            stage_refs.append((refs[pos], refs[pos + 1]))    # (wband, brow)
            pos += 2
        w1_ref, b1_ref = refs[pos], refs[pos + 1]
        pos += 2
        tail_refs = []
        for _ in range(n_mlp_layers - 1):
            tail_refs.append((refs[pos], refs[pos + 1]))
            pos += 2
        out_ref = refs[pos]
        pos += 1
        im2col_scr = refs[pos:pos + n_stage]
        pos += n_stage
        xpool_scr = refs[pos:pos + n_stage]
        pos += n_stage
        feat_scr = refs[pos]

        # Stage the sample's three dy row-windows at 128-aligned lane offsets.
        _, ho0, _, kp0, _ = stage_meta[0]
        for dy in range(3):
            im2col_scr[0][:, dy * kp0:(dy + 1) * kp0] = x_ref[dy:dy + ho0, :]

        for s, (_h_in, ho, hp, _kp, wpcp) in enumerate(stage_meta):
            wband_ref, brow_ref = stage_refs[s]
            # conv3x3 (+ pool-x grouping): ONE MXU matmul per stage.
            res = jnp.dot(im2col_scr[s][...], wband_ref[...],
                          preferred_element_type=jnp.float32)        # (ho, 3*wpcp)
            # max-pool over x: elementwise max of three 128-aligned lane groups (VPU).
            m = jnp.maximum(jnp.maximum(res[:, 0:wpcp], res[:, wpcp:2 * wpcp]),
                            res[:, 2 * wpcp:3 * wpcp])               # (ho, wpcp)
            xpool_scr[s][...] = m
            # max-pool over y: sublane-strided reads (off the MXU) + elementwise max.
            pooled = jnp.maximum(
                jnp.maximum(xpool_scr[s][pl.ds(0, hp, stride=3), :],
                            xpool_scr[s][pl.ds(1, hp, stride=3), :]),
                xpool_scr[s][pl.ds(2, hp, stride=3), :])
            pooled = pooled + brow_ref[...]     # bias after max (constant per channel)

            if s + 1 < n_stage:
                # Stage the next stage's im2col slab directly from the pooled value.
                ho_next = stage_meta[s + 1][1]
                kp_next = stage_meta[s + 1][3]   # == wpcp of this stage
                for dy in range(3):
                    im2col_scr[s + 1][:, dy * kp_next:(dy + 1) * kp_next] = \
                        pooled[dy:dy + ho_next, :]
            else:
                # Lay pooled rows out as one lane-contiguous feature row.
                for r in range(hp):
                    feat_scr[:, r * wpcp:(r + 1) * wpcp] = pooled[r:r + 1, :]

        # Fused MLP: first Linear is a single dot over the feature row.
        h = jnp.dot(feat_scr[...], w1_ref[...],
                    preferred_element_type=jnp.float32) + b1_ref[...]
        for w_ref, bias_ref in tail_refs:
            h = jnp.maximum(h, 0.0)
            h = jnp.dot(h, w_ref[...], preferred_element_type=jnp.float32) + bias_ref[...]
        out_ref[...] = h.astype(out_ref.dtype)

    return kernel


def make_explicit_conv_mlp(conv_ws, conv_bs, mlp_ws, mlp_bs,
                           input_channels, height, width, batch):
    """Prepare weights once, return a jitted forward: x (B,Cin,H,W) -> (B,act_dim)."""
    operands = []
    stage_meta = []
    h, w, c = height, width, input_channels
    k0_pad = _round_up(width * input_channels, 128)
    k_in_pad = k0_pad
    hp = wp = c_out = wpc_pad = None
    for cw, cb in zip(conv_ws, conv_bs):
        meta, wband, brow, hp, wp, c_out, wpc_pad = _build_stage_operands(
            cw, cb, h, w, c, k_in_pad)
        stage_meta.append(meta)
        operands.extend([wband, brow])
        h, w, c, k_in_pad = hp, wp, c_out, wpc_pad
    operands.extend(_build_mlp_operands(mlp_ws, mlp_bs, c_out, hp, wp, wpc_pad))

    act_dim = mlp_ws[-1].shape[1]

    # x gets one (1, H, K0_pad) block per grid step; all weights are constant blocks
    # (DMA'd once, VMEM-resident).  All weight operands are 2-D.
    in_specs = [pl.BlockSpec((None, height, k0_pad), lambda b: (b, 0, 0))]
    for op in operands:
        in_specs.append(pl.BlockSpec(op.shape, lambda b: (0, 0)))
    out_specs = pl.BlockSpec((None, 1, act_dim), lambda b: (b, 0, 0))

    scratch = ([pltpu.VMEM((m[1], 3 * m[3]), jnp.float32) for m in stage_meta]   # im2col slabs
               + [pltpu.VMEM((m[1], m[4]), jnp.float32) for m in stage_meta]     # x-pooled conv
               + [pltpu.VMEM((1, stage_meta[-1][2] * stage_meta[-1][4]),
                             jnp.float32)])                                      # feature row

    fused = pl.pallas_call(
        _make_fused_kernel(stage_meta, len(mlp_ws)),
        out_shape=jax.ShapeDtypeStruct((batch, 1, act_dim), jnp.float32),
        grid_spec=pltpu.PrefetchScalarGridSpec(
            num_scalar_prefetch=0, grid=(batch,),
            in_specs=in_specs, out_specs=out_specs, scratch_shapes=scratch),
        compiler_params=pltpu.CompilerParams(dimension_semantics=("parallel",)),
    )

    @jax.jit
    def forward(x_nchw):
        # NCHW -> (B, H, W*Cin): lane layout (w, c), rows = image rows; zero-pad lanes.
        x = jnp.transpose(x_nchw, (0, 2, 3, 1)).reshape(
            batch, height, width * input_channels).astype(jnp.float32)
        if k0_pad > width * input_channels:
            x = jnp.pad(x, ((0, 0), (0, 0), (0, k0_pad - width * input_channels)))
        return fused(x, *operands).reshape(batch, act_dim)

    return forward


# --------------------------------------------------------------------------
# Pure-JAX reference mirroring the PyTorch module semantics.
# --------------------------------------------------------------------------
def reference_forward(x_nchw, conv_ws, conv_bs, mlp_ws, mlp_bs):
    x = jnp.transpose(x_nchw, (0, 2, 3, 1))
    for w, b in zip(conv_ws, conv_bs):
        x = jax.lax.conv_general_dilated(
            x, w, (1, 1), "VALID",
            dimension_numbers=("NHWC", "HWIO", "NHWC")) + b
        x = jax.lax.reduce_window(
            x, -jnp.inf, jax.lax.max, (1, 3, 3, 1), (1, 3, 3, 1), "VALID")
    B = x.shape[0]
    h = jnp.transpose(x, (0, 3, 1, 2)).reshape(B, -1)   # per-sample NCHW flatten
    for i, (w, b) in enumerate(zip(mlp_ws, mlp_bs)):
        h = h @ w + b
        if i < len(mlp_ws) - 1:
            h = jnp.maximum(h, 0.0)
    return h


def init_params(key, input_channels, n_channels, obs_dim, act_dim, hidden_dim, n_hidden):
    conv_ws, conv_bs = [], []
    cin = input_channels
    for cout in n_channels:
        key, k1, k2 = jax.random.split(key, 3)
        bound = 1.0 / jnp.sqrt(jnp.float32(cin * 9))
        conv_ws.append(jax.random.uniform(k1, (3, 3, cin, cout), jnp.float32, -bound, bound))
        conv_bs.append(jax.random.uniform(k2, (cout,), jnp.float32, -bound, bound))
        cin = cout

    dims = [obs_dim] + [hidden_dim] * (n_hidden - 1) + [act_dim]
    mlp_ws, mlp_bs = [], []
    for din, dout in zip(dims[:-1], dims[1:]):
        key, k1, k2 = jax.random.split(key, 3)
        bound = 1.0 / jnp.sqrt(jnp.float32(din))
        mlp_ws.append(jax.random.uniform(k1, (din, dout), jnp.float32, -bound, bound))
        mlp_bs.append(jax.random.uniform(k2, (dout,), jnp.float32, -bound, bound))
    return conv_ws, conv_bs, mlp_ws, mlp_bs


if __name__ == "__main__":
    # Small config consistent with the module: two conv+maxpool stages need H=W=32.
    B, Cin, H, W = 2, 4, 32, 32
    n_channels = [8, 16]
    act_dim, hidden_dim, n_hidden = 6, 32, 3

    # Spatial sizes implied by the conv/maxpool stack: 32 -> 30 -> 10 -> 8 -> 2.
    s = H
    for _ in n_channels:
        s = (s - 2) // 3
    obs_dim = n_channels[-1] * s * s  # 16 * 2 * 2 = 64

    key = jax.random.PRNGKey(0)
    key, kx = jax.random.split(key)
    x = jax.random.normal(kx, (B, Cin, H, W), jnp.float32)   # NCHW like PyTorch

    conv_ws, conv_bs, mlp_ws, mlp_bs = init_params(
        key, Cin, n_channels, obs_dim, act_dim, hidden_dim, n_hidden)

    forward = make_explicit_conv_mlp(conv_ws, conv_bs, mlp_ws, mlp_bs, Cin, H, W, B)
    out = jax.block_until_ready(forward(x))

    ref = reference_forward(x, conv_ws, conv_bs, mlp_ws, mlp_bs)
    assert out.shape == (B, act_dim), out.shape
    assert jnp.allclose(out, ref, rtol=1e-4, atol=1e-4), (
        f"max abs diff = {jnp.max(jnp.abs(out - ref))}")

    print("KERNEL_OK")
</pallas_src>

<mosaic_0001>
module attributes {stable_mosaic.version = 11 : i64} {
  func.func @kernel(%arg0: i32, %arg1: memref<1x32x128xf32, #tpu.memory_space<vmem>>, %arg2: memref<384x384xf32, #tpu.memory_space<vmem>>, %arg3: memref<1x128xf32, #tpu.memory_space<vmem>>, %arg4: memref<384x384xf32, #tpu.memory_space<vmem>>, %arg5: memref<1x128xf32, #tpu.memory_space<vmem>>, %arg6: memref<256x32xf32, #tpu.memory_space<vmem>>, %arg7: memref<1x32xf32, #tpu.memory_space<vmem>>, %arg8: memref<32x32xf32, #tpu.memory_space<vmem>>, %arg9: memref<1x32xf32, #tpu.memory_space<vmem>>, %arg10: memref<32x6xf32, #tpu.memory_space<vmem>>, %arg11: memref<1x6xf32, #tpu.memory_space<vmem>>, %arg12: memref<1x1x6xf32, #tpu.memory_space<vmem>>, %arg13: memref<30x384xf32, #tpu.memory_space<vmem>>, %arg14: memref<8x384xf32, #tpu.memory_space<vmem>>, %arg15: memref<30x128xf32, #tpu.memory_space<vmem>>, %arg16: memref<8x128xf32, #tpu.memory_space<vmem>>, %arg17: memref<1x256xf32, #tpu.memory_space<vmem>>) attributes {dimension_semantics = [#tpu.dimension_semantics<parallel>], iteration_bounds = array<i64: 2>, scalar_prefetch = 0 : i64, scratch_operands = 5 : i64, tpu.core_type = #tpu.core_type<tc>, window_params = [{transform_indices = @transform_0, window_bounds = array<i64: 1, 32, 128>}, {pipeline_mode = #tpu.pipeline_mode<synchronous>, transform_indices = @transform_1, window_bounds = array<i64: 384, 384>}, {pipeline_mode = #tpu.pipeline_mode<synchronous>, transform_indices = @transform_2, window_bounds = array<i64: 1, 128>}, {pipeline_mode = #tpu.pipeline_mode<synchronous>, transform_indices = @transform_3, window_bounds = array<i64: 384, 384>}, {pipeline_mode = #tpu.pipeline_mode<synchronous>, transform_indices = @transform_4, window_bounds = array<i64: 1, 128>}, {pipeline_mode = #tpu.pipeline_mode<synchronous>, transform_indices = @transform_5, window_bounds = array<i64: 256, 32>}, {pipeline_mode = #tpu.pipeline_mode<synchronous>, transform_indices = @transform_6, window_bounds = array<i64: 1, 32>}, {pipeline_mode = #tpu.pipeline_mode<synchronous>, transform_indices = @transform_7, window_bounds = array<i64: 32, 32>}, {pipeline_mode = #tpu.pipeline_mode<synchronous>, transform_indices = @transform_8, window_bounds = array<i64: 1, 32>}, {pipeline_mode = #tpu.pipeline_mode<synchronous>, transform_indices = @transform_9, window_bounds = array<i64: 32, 6>}, {pipeline_mode = #tpu.pipeline_mode<synchronous>, transform_indices = @transform_10, window_bounds = array<i64: 1, 6>}, {transform_indices = @transform_11, window_bounds = array<i64: 1, 1, 6>}]} {
    %c0 = arith.constant 0 : index
    %c0_0 = arith.constant 0 : index
    %c0_1 = arith.constant 0 : index
    %0 = vector.load %arg1[%c0, %c0_0, %c0_1] : memref<1x32x128xf32, #tpu.memory_space<vmem>>, vector<1x30x128xf32>
    %1 = vector.shape_cast %0 : vector<1x30x128xf32> to vector<30x128xf32>
    %c0_2 = arith.constant 0 : index
    %c0_3 = arith.constant 0 : index
    %2 = vector.load %arg13[%c0_2, %c0_3] : memref<30x384xf32, #tpu.memory_space<vmem>>, vector<30x128xf32>
    tpu.vector_store %arg13[%c0_2, %c0_3], %1 {strides = array<i32>} : memref<30x384xf32, #tpu.memory_space<vmem>>, vector<30x128xf32>,
    %c0_4 = arith.constant 0 : index
    %c1 = arith.constant 1 : index
    %c0_5 = arith.constant 0 : index
    %3 = vector.load %arg1[%c0_4, %c1, %c0_5] : memref<1x32x128xf32, #tpu.memory_space<vmem>>, vector<1x30x128xf32>
    %4 = vector.shape_cast %3 : vector<1x30x128xf32> to vector<30x128xf32>
    %c0_6 = arith.constant 0 : index
    %c128 = arith.constant 128 : index
    %5 = vector.load %arg13[%c0_6, %c128] : memref<30x384xf32, #tpu.memory_space<vmem>>, vector<30x128xf32>
    tpu.vector_store %arg13[%c0_6, %c128], %4 {strides = array<i32>} : memref<30x384xf32, #tpu.memory_space<vmem>>, vector<30x128xf32>,
    %c0_7 = arith.constant 0 : index
    %c2 = arith.constant 2 : index
    %c0_8 = arith.constant 0 : index
    %6 = vector.load %arg1[%c0_7, %c2, %c0_8] : memref<1x32x128xf32, #tpu.memory_space<vmem>>, vector<1x30x128xf32>
    %7 = vector.shape_cast %6 : vector<1x30x128xf32> to vector<30x128xf32>
    %c0_9 = arith.constant 0 : index
    %c256 = arith.constant 256 : index
    %8 = vector.load %arg13[%c0_9, %c256] : memref<30x384xf32, #tpu.memory_space<vmem>>, vector<30x128xf32>
    tpu.vector_store %arg13[%c0_9, %c256], %7 {strides = array<i32>} : memref<30x384xf32, #tpu.memory_space<vmem>>, vector<30x128xf32>,
    %c0_10 = arith.constant 0 : index
    %c0_11 = arith.constant 0 : index
    %9 = vector.load %arg13[%c0_10, %c0_11] : memref<30x384xf32, #tpu.memory_space<vmem>>, vector<30x384xf32>
    %c0_12 = arith.constant 0 : index
    %c0_13 = arith.constant 0 : index
    %10 = vector.load %arg2[%c0_12, %c0_13] : memref<384x384xf32, #tpu.memory_space<vmem>>, vector<384x384xf32>
    %cst = arith.constant dense<0.000000e+00> : vector<30x384xf32>
    %11 = tpu.matmul %9, %10, %cst {dimension_numbers = #tpu.dot_dimension_numbers<[1], [0], [0], [1], [0, 0, 1, 1], [], []>} : vector<30x384xf32>, vector<384x384xf32>, vector<30x384xf32> -> vector<30x384xf32>
    %12 = vector.extract_strided_slice %11 {offsets = [0, 0], sizes = [30, 128], strides = [1, 1]} : vector<30x384xf32> to vector<30x128xf32>
    %13 = vector.extract_strided_slice %11 {offsets = [0, 128], sizes = [30, 128], strides = [1, 1]} : vector<30x384xf32> to vector<30x128xf32>
    %14 = arith.maximumf %12, %13 : vector<30x128xf32>
    %15 = vector.extract_strided_slice %11 {offsets = [0, 256], sizes = [30, 128], strides = [1, 1]} : vector<30x384xf32> to vector<30x128xf32>
    %16 = arith.maximumf %14, %15 : vector<30x128xf32>
    %c0_14 = arith.constant 0 : index
    %c0_15 = arith.constant 0 : index
    %17 = vector.load %arg15[%c0_14, %c0_15] : memref<30x128xf32, #tpu.memory_space<vmem>>, vector<30x128xf32>
    tpu.vector_store %arg15[%c0_14, %c0_15], %16 {strides = array<i32>} : memref<30x128xf32, #tpu.memory_space<vmem>>, vector<30x128xf32>,
    %c0_16 = arith.constant 0 : index
    %c0_17 = arith.constant 0 : index
    %18 = tpu.strided_load %arg15[%c0_16, %c0_17] {strides = array<i32: 3, 1>} : memref<30x128xf32, #tpu.memory_space<vmem>>, vector<10x128xf32>
    %c1_18 = arith.constant 1 : index
    %c0_19 = arith.constant 0 : index
    %19 = tpu.strided_load %arg15[%c1_18, %c0_19] {strides = array<i32: 3, 1>} : memref<30x128xf32, #tpu.memory_space<vmem>>, vector<10x128xf32>
    %20 = arith.maximumf %18, %19 : vector<10x128xf32>
    %c2_20 = arith.constant 2 : index
    %c0_21 = arith.constant 0 : index
    %21 = tpu.strided_load %arg15[%c2_20, %c0_21] {strides = array<i32: 3, 1>} : memref<30x128xf32, #tpu.memory_space<vmem>>, vector<10x128xf32>
    %22 = arith.maximumf %20, %21 : vector<10x128xf32>
    %c0_22 = arith.constant 0 : index
    %c0_23 = arith.constant 0 : index
    %23 = vector.load %arg3[%c0_22, %c0_23] : memref<1x128xf32, #tpu.memory_space<vmem>>, vector<1x128xf32>
    %24 = vector.broadcast %23 : vector<1x128xf32> to vector<10x128xf32>
    %25 = arith.addf %22, %24 : vector<10x128xf32>
    %26 = vector.extract_strided_slice %25 {offsets = [0, 0], sizes = [8, 128], strides = [1, 1]} : vector<10x128xf32> to vector<8x128xf32>
    %c0_24 = arith.constant 0 : index
    %c0_25 = arith.constant 0 : index
    %27 = vector.load %arg14[%c0_24, %c0_25] : memref<8x384xf32, #tpu.memory_space<vmem>>, vector<8x128xf32>
    tpu.vector_store %arg14[%c0_24, %c0_25], %26 {strides = array<i32>} : memref<8x384xf32, #tpu.memory_space<vmem>>, vector<8x128xf32>,
    %28 = vector.extract_strided_slice %25 {offsets = [1, 0], sizes = [8, 128], strides = [1, 1]} : vector<10x128xf32> to vector<8x128xf32>
    %c0_26 = arith.constant 0 : index
    %c128_27 = arith.constant 128 : index
    %29 = vector.load %arg14[%c0_26, %c128_27] : memref<8x384xf32, #tpu.memory_space<vmem>>, vector<8x128xf32>
    tpu.vector_store %arg14[%c0_26, %c128_27], %28 {strides = array<i32>} : memref<8x384xf32, #tpu.memory_space<vmem>>, vector<8x128xf32>,
    %30 = vector.extract_strided_slice %25 {offsets = [2, 0], sizes = [8, 128], strides = [1, 1]} : vector<10x128xf32> to vector<8x128xf32>
    %c0_28 = arith.constant 0 : index
    %c256_29 = arith.constant 256 : index
    %31 = vector.load %arg14[%c0_28, %c256_29] : memref<8x384xf32, #tpu.memory_space<vmem>>, vector<8x128xf32>
    tpu.vector_store %arg14[%c0_28, %c256_29], %30 {strides = array<i32>} : memref<8x384xf32, #tpu.memory_space<vmem>>, vector<8x128xf32>,
    %c0_30 = arith.constant 0 : index
    %c0_31 = arith.constant 0 : index
    %32 = vector.load %arg14[%c0_30, %c0_31] : memref<8x384xf32, #tpu.memory_space<vmem>>, vector<8x384xf32>
    %c0_32 = arith.constant 0 : index
    %c0_33 = arith.constant 0 : index
    %33 = vector.load %arg4[%c0_32, %c0_33] : memref<384x384xf32, #tpu.memory_space<vmem>>, vector<384x384xf32>
    %cst_34 = arith.constant dense<0.000000e+00> : vector<8x384xf32>
    %34 = tpu.matmul %32, %33, %cst_34 {dimension_numbers = #tpu.dot_dimension_numbers<[1], [0], [0], [1], [0, 0, 1, 1], [], []>} : vector<8x384xf32>, vector<384x384xf32>, vector<8x384xf32> -> vector<8x384xf32>
    %35 = vector.extract_strided_slice %34 {offsets = [0, 0], sizes = [8, 128], strides = [1, 1]} : vector<8x384xf32> to vector<8x128xf32>
    %36 = vector.extract_strided_slice %34 {offsets = [0, 128], sizes = [8, 128], strides = [1, 1]} : vector<8x384xf32> to vector<8x128xf32>
    %37 = arith.maximumf %35, %36 : vector<8x128xf32>
    %38 = vector.extract_strided_slice %34 {offsets = [0, 256], sizes = [8, 128], strides = [1, 1]} : vector<8x384xf32> to vector<8x128xf32>
    %39 = arith.maximumf %37, %38 : vector<8x128xf32>
    %c0_35 = arith.constant 0 : index
    %c0_36 = arith.constant 0 : index
    %40 = vector.load %arg16[%c0_35, %c0_36] : memref<8x128xf32, #tpu.memory_space<vmem>>, vector<8x128xf32>
    tpu.vector_store %arg16[%c0_35, %c0_36], %39 {strides = array<i32>} : memref<8x128xf32, #tpu.memory_space<vmem>>, vector<8x128xf32>,
    %c0_37 = arith.constant 0 : index
    %c0_38 = arith.constant 0 : index
    %41 = tpu.strided_load %arg16[%c0_37, %c0_38] {strides = array<i32: 3, 1>} : memref<8x128xf32, #tpu.memory_space<vmem>>, vector<2x128xf32>
    %c1_39 = arith.constant 1 : index
    %c0_40 = arith.constant 0 : index
    %42 = tpu.strided_load %arg16[%c1_39, %c0_40] {strides = array<i32: 3, 1>} : memref<8x128xf32, #tpu.memory_space<vmem>>, vector<2x128xf32>
    %43 = arith.maximumf %41, %42 : vector<2x128xf32>
    %c2_41 = arith.constant 2 : index
    %c0_42 = arith.constant 0 : index
    %44 = tpu.strided_load %arg16[%c2_41, %c0_42] {strides = array<i32: 3, 1>} : memref<8x128xf32, #tpu.memory_space<vmem>>, vector<2x128xf32>
    %45 = arith.maximumf %43, %44 : vector<2x128xf32>
    %c0_43 = arith.constant 0 : index
    %c0_44 = arith.constant 0 : index
    %46 = vector.load %arg5[%c0_43, %c0_44] : memref<1x128xf32, #tpu.memory_space<vmem>>, vector<1x128xf32>
    %47 = vector.broadcast %46 : vector<1x128xf32> to vector<2x128xf32>
    %48 = arith.addf %45, %47 : vector<2x128xf32>
    %49 = vector.extract_strided_slice %48 {offsets = [0, 0], sizes = [1, 128], strides = [1, 1]} : vector<2x128xf32> to vector<1x128xf32>
    %c0_45 = arith.constant 0 : index
    %c0_46 = arith.constant 0 : index
    %50 = vector.load %arg17[%c0_45, %c0_46] : memref<1x256xf32, #tpu.memory_space<vmem>>, vector<1x128xf32>
    tpu.vector_store %arg17[%c0_45, %c0_46], %49 {strides = array<i32>} : memref<1x256xf32, #tpu.memory_space<vmem>>, vector<1x128xf32>,
    %51 = vector.extract_strided_slice %48 {offsets = [1, 0], sizes = [1, 128], strides = [1, 1]} : vector<2x128xf32> to vector<1x128xf32>
    %c0_47 = arith.constant 0 : index
    %c128_48 = arith.constant 128 : index
    %52 = vector.load %arg17[%c0_47, %c128_48] : memref<1x256xf32, #tpu.memory_space<vmem>>, vector<1x128xf32>
    tpu.vector_store %arg17[%c0_47, %c128_48], %51 {strides = array<i32>} : memref<1x256xf32, #tpu.memory_space<vmem>>, vector<1x128xf32>,
    %c0_49 = arith.constant 0 : index
    %c0_50 = arith.constant 0 : index
    %53 = vector.load %arg17[%c0_49, %c0_50] : memref<1x256xf32, #tpu.memory_space<vmem>>, vector<1x256xf32>
    %c0_51 = arith.constant 0 : index
    %c0_52 = arith.constant 0 : index
    %54 = vector.load %arg6[%c0_51, %c0_52] : memref<256x32xf32, #tpu.memory_space<vmem>>, vector<256x32xf32>
    %cst_53 = arith.constant dense<0.000000e+00> : vector<1x32xf32>
    %55 = tpu.matmul %53, %54, %cst_53 {dimension_numbers = #tpu.dot_dimension_numbers<[1], [0], [0], [1], [0, 0, 1, 1], [], []>} : vector<1x256xf32>, vector<256x32xf32>, vector<1x32xf32> -> vector<1x32xf32>
    %c0_54 = arith.constant 0 : index
    %c0_55 = arith.constant 0 : index
    %56 = vector.load %arg7[%c0_54, %c0_55] : memref<1x32xf32, #tpu.memory_space<vmem>>, vector<1x32xf32>
    %57 = arith.addf %55, %56 : vector<1x32xf32>
    %cst_56 = arith.constant 0.000000e+00 : f32
    %58 = vector.broadcast %cst_56 : f32 to vector<1x32xf32>
    %59 = arith.maximumf %57, %58 : vector<1x32xf32>
    %c0_57 = arith.constant 0 : index
    %c0_58 = arith.constant 0 : index
    %60 = vector.load %arg8[%c0_57, %c0_58] : memref<32x32xf32, #tpu.memory_space<vmem>>, vector<32x32xf32>
    %cst_59 = arith.constant dense<0.000000e+00> : vector<1x32xf32>
    %61 = tpu.matmul %59, %60, %cst_59 {dimension_numbers = #tpu.dot_dimension_numbers<[1], [0], [0], [1], [0, 0, 1, 1], [], []>} : vector<1x32xf32>, vector<32x32xf32>, vector<1x32xf32> -> vector<1x32xf32>
    %c0_60 = arith.constant 0 : index
    %c0_61 = arith.constant 0 : index
    %62 = vector.load %arg9[%c0_60, %c0_61] : memref<1x32xf32, #tpu.memory_space<vmem>>, vector<1x32xf32>
    %63 = arith.addf %61, %62 : vector<1x32xf32>
    %cst_62 = arith.constant 0.000000e+00 : f32
    %64 = vector.broadcast %cst_62 : f32 to vector<1x32xf32>
    %65 = arith.maximumf %63, %64 : vector<1x32xf32>
    %c0_63 = arith.constant 0 : index
    %c0_64 = arith.constant 0 : index
    %66 = vector.load %arg10[%c0_63, %c0_64] : memref<32x6xf32, #tpu.memory_space<vmem>>, vector<32x6xf32>
    %cst_65 = arith.constant dense<0.000000e+00> : vector<1x6xf32>
    %67 = tpu.matmul %65, %66, %cst_65 {dimension_numbers = #tpu.dot_dimension_numbers<[1], [0], [0], [1], [0, 0, 1, 1], [], []>} : vector<1x32xf32>, vector<32x6xf32>, vector<1x6xf32> -> vector<1x6xf32>
    %c0_66 = arith.constant 0 : index
    %c0_67 = arith.constant 0 : index
    %68 = vector.load %arg11[%c0_66, %c0_67] : memref<1x6xf32, #tpu.memory_space<vmem>>, vector<1x6xf32>
    %69 = arith.addf %67, %68 : vector<1x6xf32>
    %c0_68 = arith.constant 0 : index
    %c0_69 = arith.constant 0 : index
    %c0_70 = arith.constant 0 : index
    %70 = vector.load %arg12[%c0_68, %c0_69, %c0_70] : memref<1x1x6xf32, #tpu.memory_space<vmem>>, vector<1x1x6xf32>
    %71 = vector.shape_cast %70 : vector<1x1x6xf32> to vector<1x6xf32>
    %72 = vector.shape_cast %69 : vector<1x6xf32> to vector<1x1x6xf32>
    tpu.vector_store %arg12[%c0_68, %c0_69, %c0_70], %72 {strides = array<i32>} : memref<1x1x6xf32, #tpu.memory_space<vmem>>, vector<1x1x6xf32>,
    return
  }
  func.func @transform_0(%arg0: i32) -> (i32, i32, i32) {
    %c0_i32 = arith.constant 0 : i32
    %c0_i32_0 = arith.constant 0 : i32
    %c0_i32_1 = arith.constant 0 : i32
    return %arg0, %c0_i32, %c0_i32_0 : i32, i32, i32
  }
  func.func @transform_1(%arg0: i32) -> (i32, i32) {
    %c0_i32 = arith.constant 0 : i32
    %c0_i32_0 = arith.constant 0 : i32
    %c0_i32_1 = arith.constant 0 : i32
    return %c0_i32, %c0_i32_0 : i32, i32
  }
  func.func @transform_2(%arg0: i32) -> (i32, i32) {
    %c0_i32 = arith.constant 0 : i32
    %c0_i32_0 = arith.constant 0 : i32
    %c0_i32_1 = arith.constant 0 : i32
    return %c0_i32, %c0_i32_0 : i32, i32
  }
  func.func @transform_3(%arg0: i32) -> (i32, i32) {
    %c0_i32 = arith.constant 0 : i32
    %c0_i32_0 = arith.constant 0 : i32
    %c0_i32_1 = arith.constant 0 : i32
    return %c0_i32, %c0_i32_0 : i32, i32
  }
  func.func @transform_4(%arg0: i32) -> (i32, i32) {
    %c0_i32 = arith.constant 0 : i32
    %c0_i32_0 = arith.constant 0 : i32
    %c0_i32_1 = arith.constant 0 : i32
    return %c0_i32, %c0_i32_0 : i32, i32
  }
  func.func @transform_5(%arg0: i32) -> (i32, i32) {
    %c0_i32 = arith.constant 0 : i32
    %c0_i32_0 = arith.constant 0 : i32
    %c0_i32_1 = arith.constant 0 : i32
    return %c0_i32, %c0_i32_0 : i32, i32
  }
  func.func @transform_6(%arg0: i32) -> (i32, i32) {
    %c0_i32 = arith.constant 0 : i32
    %c0_i32_0 = arith.constant 0 : i32
    %c0_i32_1 = arith.constant 0 : i32
    return %c0_i32, %c0_i32_0 : i32, i32
  }
  func.func @transform_7(%arg0: i32) -> (i32, i32) {
    %c0_i32 = arith.constant 0 : i32
    %c0_i32_0 = arith.constant 0 : i32
    %c0_i32_1 = arith.constant 0 : i32
    return %c0_i32, %c0_i32_0 : i32, i32
  }
  func.func @transform_8(%arg0: i32) -> (i32, i32) {
    %c0_i32 = arith.constant 0 : i32
    %c0_i32_0 = arith.constant 0 : i32
    %c0_i32_1 = arith.constant 0 : i32
    return %c0_i32, %c0_i32_0 : i32, i32
  }
  func.func @transform_9(%arg0: i32) -> (i32, i32) {
    %c0_i32 = arith.constant 0 : i32
    %c0_i32_0 = arith.constant 0 : i32
    %c0_i32_1 = arith.constant 0 : i32
    return %c0_i32, %c0_i32_0 : i32, i32
  }
  func.func @transform_10(%arg0: i32) -> (i32, i32) {
    %c0_i32 = arith.constant 0 : i32
    %c0_i32_0 = arith.constant 0 : i32
    %c0_i32_1 = arith.constant 0 : i32
    return %c0_i32, %c0_i32_0 : i32, i32
  }
  func.func @transform_11(%arg0: i32) -> (i32, i32, i32) {
    %c0_i32 = arith.constant 0 : i32
    %c0_i32_0 = arith.constant 0 : i32
    %c0_i32_1 = arith.constant 0 : i32
    return %arg0, %c0_i32, %c0_i32_0 : i32, i32, i32
  }
}

</mosaic_0001>

<bundles_post_ra>
// kernel: forward.1
= control target key start
LH: loop header
LB: loop body
LE: loop exit
PB: predicated region body
PF: predicated region fallthrough
CT: control target
= control target key end

     0   :  { %16 = vsyncpa [#allocation8], 0  ;;  %s2144_s0 = inlined_call_operand.vmem [shape: f32[2,32,128], index: 0, kind: input, shape index: {}]   ;;  %s2145_s1 = inlined_call_operand.hbm [shape: f32[384,384], index: 1, kind: input, shape index: {}]   ;;  %s2146_s2 = inlined_call_operand.vmem [shape: f32[1,128], index: 2, kind: input, shape index: {}]   ;;  %s2147_s3 = inlined_call_operand.hbm [shape: f32[384,384], index: 3, kind: input, shape index: {}]   ;;  %s2148_s4 = inlined_call_operand.vmem [shape: f32[1,128], index: 4, kind: input, shape index: {}]   ;;  %s2149_s5 = inlined_call_operand.vmem [shape: f32[256,32], index: 5, kind: input, shape index: {}]   ;;  %s2150_s6 = inlined_call_operand.vmem [shape: f32[1,32], index: 6, kind: input, shape index: {}]   ;;  %s2151_s7 = inlined_call_operand.vmem [shape: f32[32,32], index: 7, kind: input, shape index: {}]   ;;  %s2152_s8 = inlined_call_operand.vmem [shape: f32[1,32], index: 8, kind: input, shape index: {}]   ;;  %s2153_s9 = inlined_call_operand.vmem [shape: f32[32,6], index: 9, kind: input, shape index: {}]   ;;  %s2154_s10 = inlined_call_operand.vmem [shape: f32[1,6], index: 10, kind: input, shape index: {}]   ;;  %s2155_s11 = inlined_call_operand.hbm [shape: f32[2,1,6], index: 11, kind: output, shape index: {}]  }
   0x1   :  { %17 = vsyncpa [#allocation11], 0 }
   0x2   :  { %18 = vsyncpa [#allocation9], 0 }
   0x3   :  { %20 = vsyncpa [#allocation9 + $0x1], 0  ;;  %s1765_s17 = smov 0   ;;  %s1767_s18 = smov 0  }
   0x4   :  { %s1769_s19 = smov 0   ;;  %s1771_s20 = smov 0  }
   0x5 LB: > { %2157 = sst [smem:[#allocation16_spill]] %s1695_s19  ;;  %s1786_s21 = sadd.s32 4294967295, %s1699_s20   ;;  %s1699_s20 = sphi %s1771_s20, %s2166_s20   ;;  %s1695_s19 = sphi %s1769_s19, %s2163_s19   ;;  %s1691_s18 = sphi %s1767_s18, %s2165_s18   ;;  %s1687_s17 = sphi %s1765_s17, %s2164_s17  }
   0x6   : > { %s1490_s22 = sadd.s32 4294967294, %s1699_s20   ;;  %s1790_s23 = sadd.s32 1, %s1699_s20  }
   0x7   : > { %s269_s24 = sadd.s32 1, %s1695_s19  ;;  %s266_s25 = ssub.s32 %s1699_s20, %s1790_s23 }
   0x8   : > { %p279_p0 = scmp.ne.s32.totalorder %s1695_s19, %s1691_s18  ;;  %p267_p1 = scmp.eq.s32.totalorder %s266_s25, 0 }
   0x9   : > { %p280_p2 = scmp.eq.s32.totalorder %s1786_s21, 1  ;;  %p285_p3 = scmp.ne.s32.totalorder %s1691_s18, %s1687_s17 }
   0xa   : > { %p286_p4 = scmp.eq.s32.totalorder %s1490_s22, 1  ;;  %p1491_p7 = scmp.ge.s32.totalorder %s1699_s20, 1 }
   0xb   : > { %s1801_s26 = scalar_select %p267_p1, %s1695_s19, %s269_s24  }
   0xc   : > { %p1803_p5 = por %p280_p2, %p279_p0  ;;  %p1807_p6 = por %p286_p4, %p285_p3 }
   0xd   : > { %2158 = sst [smem:[#allocation17_spill]] %s1801_s26  ;;  %p293_p8 = scmp.lt.s32.totalorder %s1699_s20, 3 }
   0xe   : > { %p1526_p9 = scmp.eq.s32.totalorder %s1786_s21, 0  ;;  %s304_s13 = sshll.u32 %s2145_s1, 4  ;;  %s305_s13 = int_to_ptr.hbm [resolvable:$true] %s304_s13 }
   0xf   : > { %p1814_p10 = pnand %p1491_p7, %p293_p8  ;;  %s1701_s14 = smov [#allocation7]  }
  0x10   : > { %s306_s15 = sshll.u32 %s1701_s14, 4  ;;  %s321_s24 = sshll.u32 %s2147_s3, 4  ;;  %s307_s15 = int_to_ptr.vmem [resolvable:$true] %s306_s15  ;;  %s322_s24 = int_to_ptr.hbm [resolvable:$true] %s321_s24 }
  0x11   : > { %p1515_p11 = pneg %p1814_p10  ;;  %s1702_s25 = smov 384  }
  0x12   : > { %s1703_s26 = smov 24   ;;  %s1704_s19 = smov [#allocation10]  }
  0x13   : > { %p1516_p12 = pnand %p1526_p9, %p1515_p11  ;;  %s323_s30 = sshll.u32 %s1704_s19, 4  ;;  %s324_s30 = int_to_ptr.vmem [resolvable:$true] %s323_s30 }
  0x14   : > { %368 = sbr.rel (%p1814_p10) target bundleno = 879 (0x36f), region = 64 }
  0x15   : > { %1518 = dma.hbm_to_vmem [thread:$0]  (!%p1516_p12), %s305_s13, 18432, %s307_s15, [#allocation8], %s1702_s25, %s1702_s25, %s1703_s26  }
  0x16   : > { %1521 = dma.hbm_to_vmem [thread:$0]  (!%p1516_p12), %s322_s24, 18432, %s324_s30, [#allocation11], %s1702_s25, %s1702_s25, %s1703_s26  }
  0x19   : > { %1674 = dma.done.wait (%p1526_p9), [#allocation8], 18432  }
  0x1a   : > { %1676 = vsyncadd (%p1526_p9), [#allocation8], 4294948864 }
  0x1b   : > { %1678 = dma.done.wait (%p1526_p9), [#allocation11], 18432  }
  0x1c   : > { %1680 = vsyncadd (%p1526_p9), [#allocation11], 4294948864  ;;  %v499_v0 = vld [vmem:[#allocation7 + $0x168] sm:$0xff]  ;;  %v496_v3 = vld [vmem:[#allocation7 + $0x150] sm:$0xff]  ;;  %p413_p13 = scmp.lt.s32.totalorder %s1786_s21, 1  ;;  %vm895_vm0 = vcmask 1046528  }
  0x1d   : > { %v547_v1 = vld [vmem:[#allocation7 + $0x2e8] sm:$0xff]  ;;  %598 = vmatpush.msra.mxu0 %v499_v0  ;;  %v544_v4 = vld [vmem:[#allocation7 + $0x2d0] sm:$0xff]  ;;  %v493_v6 = vld [vmem:[#allocation7 + $0x138] sm:$0xff]  ;;  %vm901_vm1 = vcmask 1045504   ;;  %vm1345_vm3 = vcmask 261120   ;;  %s411_s24 = sand.u32 1, %s1691_s18  }
  0x1e   : > { %v595_v2 = vld [vmem:[#allocation7 + $0x468] sm:$0xff]  ;;  %627 = vmatpush.msra.mxu1 %v547_v1  ;;  %v592_v5 = vld [vmem:[#allocation7 + $0x450] sm:$0xff]  ;;  %v541_v7 = vld [vmem:[#allocation7 + $0x2b8] sm:$0xff]  ;;  %s414_s19 = scalar_select %p413_p13, %s1786_s21, 1  ;;  %vm1398_vm4 = vcmask 40960  }
  0x1f   : > { %656 = vmatpush.msra.mxu2 %v595_v2  ;;  %599 = vmatpush.msra.mxu0 %v496_v3  ;;  %v589_v8 = vld [vmem:[#allocation7 + $0x438] sm:$0xff]  ;;  %v490_v9 = vld [vmem:[#allocation7 + $0x120] sm:$0xff]  ;;  %v487_v12 = vld [vmem:[#allocation7 + $0x108] sm:$0xff]  ;;  %s412_s12 = scalar_lea.vmem [#allocation12], %s411_s24  ;;  %s1401_s15 = scalar_lea.sflag [#allocation9], %s411_s24 }
  0x20   : > { %628 = vmatpush.msra.mxu1 %v544_v4  ;;  %v538_v10 = vld [vmem:[#allocation7 + $0x2a0] sm:$0xff]  ;;  %v535_v13 = vld [vmem:[#allocation7 + $0x288] sm:$0xff]  ;;  %v484_v15 = vld [vmem:[#allocation7 + $0xf0] sm:$0xff]  ;;  %s1504_s26 = sshll.u32 %s414_s19, 5  ;;  %s1409_s19 = scalar_lea.hbm %s2155_s11, %s1786_s21 }
  0x21   : > { %657 = vmatpush.msra.mxu2 %v592_v5  ;;  %600 = vmatpush.msra.mxu0 %v493_v6  ;;  %v586_v11 = vld [vmem:[#allocation7 + $0x420] sm:$0xff]  ;;  %v583_v14 = vld [vmem:[#allocation7 + $0x408] sm:$0xff]  ;;  %v532_v16 = vld [vmem:[#allocation7 + $0x270] sm:$0xff]  ;;  %s1843_s13 = scalar_lea.vmem %s2144_s0, %s1504_s26  ;;  %s1413_s14 = sshll.u32 %s1409_s19, 4  ;;  %s1414_s14 = int_to_ptr.hbm [resolvable:$true] %s1413_s14 }
  0x22   : > { %629 = vmatpush.msra.mxu1 %v541_v7  ;;  %v580_v17 = vld [vmem:[#allocation7 + $0x3f0] sm:$0xff]  ;;  %v481_v18 = vld [vmem:[#allocation7 + $0xd8] sm:$0xff]  ;;  %v478_v21 = vld [vmem:[#allocation7 + $0xc0] sm:$0xff]  ;;  %s1643_s16 = sshra.s32 %s1414_s14, 4  ;;  %s1649_s30 = scalar_lea.hbm %s2155_s11, 2  ;;  %s1644_s16 = int_to_ptr.hbm [resolvable:$true] %s1643_s16 }
  0x23   : > { %658 = vmatpush.msra.mxu2 %v589_v8  ;;  %601 = vmatpush.msra.mxu0 %v490_v9  ;;  %v529_v19 = vld [vmem:[#allocation7 + $0x258] sm:$0xff]  ;;  %v526_v22 = vld [vmem:[#allocation7 + $0x240] sm:$0xff]  ;;  %v500_v24 = vld [vmem:[#allocation7 + $0x170] sm:$0xff]  ;;  %s1645_s22 = scalar_lea.hbm %s1644_s16, 1  ;;  %p1650_p3 = scmp.lt.s32.totalorder %s1644_s16, %s2155_s11 }
  0x24   : > { %630 = vmatpush.msra.mxu1 %v538_v10  ;;  %v577_v20 = vld [vmem:[#allocation7 + $0x3d8] sm:$0xff]  ;;  %v574_v23 = vld [vmem:[#allocation7 + $0x3c0] sm:$0xff]  ;;  %v475_v25 = vld [vmem:[#allocation7 + $0xa8] sm:$0xff]  ;;  %685 = vmatpush.msra.mxu3 %v500_v24  ;;  %p1646_p0 = scmp.ne.s32.totalorder %s1644_s16, %s1645_s22  ;;  %p1651_p4 = scmp.lt.s32.totalorder %s1649_s30, %s1645_s22 }
  0x25   : > { %659 = vmatpush.msra.mxu2 %v586_v11  ;;  %602 = vmatpush.msra.mxu0 %v487_v12  ;;  %v523_v26 = vld [vmem:[#allocation7 + $0x228] sm:$0xff]  ;;  %v497_v27 = vld [vmem:[#allocation7 + $0x158] sm:$0xff]  ;;  %v494_v29 = vld [vmem:[#allocation7 + $0x140] sm:$0xff] }
  0x26   : > { %631 = vmatpush.msra.mxu1 %v535_v13  ;;  %v571_v28 = vld [vmem:[#allocation7 + $0x3a8] sm:$0xff]  ;;  %v472_v30 = vld [vmem:[#allocation7 + $0x90] sm:$0xff]  ;;  %686 = vmatpush.msra.mxu3 %v497_v27  ;;  %v469_v35 = vld [vmem:[#allocation7 + $0x78] sm:$0xff]  ;;  %p1647_p1 = pnand %p1646_p0, %p1803_p5  ;;  %p1652_p7 = por %p1651_p4, %p1650_p3 }
  0x27   : > { %660 = vmatpush.msra.mxu2 %v583_v14  ;;  %603 = vmatpush.msra.mxu0 %v484_v15  ;;  %v520_v31 = vld [vmem:[#allocation7 + $0x210] sm:$0xff]  ;;  %v491_v33 = vld [vmem:[#allocation7 + $0x128] sm:$0xff]  ;;  %v517_v36 = vld [vmem:[#allocation7 + $0x1f8] sm:$0xff] }
  0x28   : > { %632 = vmatpush.msra.mxu1 %v532_v16  ;;  %v568_v32 = vld [vmem:[#allocation7 + $0x390] sm:$0xff]  ;;  %687 = vmatpush.msra.mxu3 %v494_v29  ;;  %v565_v38 = vld [vmem:[#allocation7 + $0x378] sm:$0xff]  ;;  %v466_v41 = vld [vmem:[#allocation7 + $0x60] sm:$0xff]  ;;  %p1648_p2 = pneg %p1647_p1 }
  0x29   : > { %661 = vmatpush.msra.mxu2 %v580_v17  ;;  %604 = vmatpush.msra.mxu0 %v481_v18  ;;  %v1846_v34 = vld [vmem:[%s1843_s13] sm:$0xff]  ;;  %v514_v42 = vld [vmem:[#allocation7 + $0x1e0] sm:$0xff]  ;;  %v485_v44 = vld [vmem:[#allocation7 + $0xf8] sm:$0xff] }
  0x2a   : > { %633 = vmatpush.msra.mxu1 %v529_v19  ;;  %v1849_v37 = vld [vmem:[%s1843_s13 + $0x1] sm:$0xff]  ;;  %688 = vmatpush.msra.mxu3 %v491_v33  ;;  %v562_v43 = vld [vmem:[#allocation7 + $0x360] sm:$0xff]  ;;  %v1858_v50 = vld [vmem:[%s1843_s13 + $0x9] sm:$0xff]  ;;  %p1653_p8 = pnand %p1652_p7, %p1648_p2 }
  0x2b   : > { %662 = vmatpush.msra.mxu2 %v577_v20  ;;  %605 = vmatpush.msra.mxu0 %v478_v21  ;;  %v1852_v39 = vld [vmem:[%s1843_s13 + $0x2] sm:$0xff]  ;;  %v463_v45 = vld [vmem:[#allocation7 + $0x48] sm:$0xff]  ;;  %v482_v49 = vld [vmem:[#allocation7 + $0xe0] sm:$0xff] }
  0x2c   : > { %634 = vmatpush.msra.mxu1 %v526_v22  ;;  %v488_v40 = vld [vmem:[#allocation7 + $0x110] sm:$0xff]  ;;  %v511_v46 = vld [vmem:[#allocation7 + $0x1c8] sm:$0xff]  ;;  %v1861_v53 = vld [vmem:[%s1843_s13 + $0xa] sm:$0xff] }
  0x2d   : > { %663 = vmatpush.msra.mxu2 %v574_v23  ;;  %606 = vmatpush.msra.mxu0 %v475_v25  ;;  %v1855_v47 = vld [vmem:[%s1843_s13 + $0x8] sm:$0xff]  ;;  %v559_v48 = vld [vmem:[#allocation7 + $0x348] sm:$0xff]  ;;  %v1864_v60 = vld [vmem:[%s1843_s13 + $0x10] sm:$0xff] }
  0x2e   : > { %635 = vmatpush.msra.mxu1 %v523_v26  ;;  %689 = vmatpush.msra.mxu3 %v488_v40  ;;  %v460_v51 = vld [vmem:[#allocation7 + $0x30] sm:$0xff]  ;;  %v479_v55 = vld [vmem:[#allocation7 + $0xc8] sm:$0xff]  ;;  %v457_v56 = vld [vmem:[#allocation7 + $0x18] sm:$0xff] }
  0x2f   : > { %664 = vmatpush.msra.mxu2 %v571_v28  ;;  %607 = vmatpush.msra.mxu0 %v472_v30  ;;  %v508_v52 = vld [vmem:[#allocation7 + $0x1b0] sm:$0xff]  ;;  %v505_v57 = vld [vmem:[#allocation7 + $0x198] sm:$0xff]  ;;  %v454_v61 = vld [vmem:[#allocation7] sm:$0xff] }
  0x30   : > { %636 = vmatpush.msra.mxu1 %v520_v31  ;;  %690 = vmatpush.msra.mxu3 %v485_v44  ;;  %v556_v54 = vld [vmem:[#allocation7 + $0x330] sm:$0xff]  ;;  %v553_v58 = vld [vmem:[#allocation7 + $0x318] sm:$0xff]  ;;  %v502_v62 = vld [vmem:[#allocation7 + $0x180] sm:$0xff] }
  0x31   : > { %665 = vmatpush.msra.mxu2 %v568_v32  ;;  %608 = vmatpush.msra.mxu0 %v469_v35  ;;  %v476_v59 = vld [vmem:[#allocation7 + $0xb0] sm:$0xff]  ;;  %v1867_v63 = vld [vmem:[%s1843_s13 + $0x11] sm:$0xff]  ;;  %v429_v6 = vld [vmem:[%s1843_s13 + $0x19] sm:$0x3f] }
  0x32   : > { %637 = vmatpush.msra.mxu1 %v517_v36  ;;  %691 = vmatpush.msra.mxu3 %v482_v49  ;;  %v550_v0 = vld [vmem:[#allocation7 + $0x300] sm:$0xff]  ;;  %v548_v2 = vld [vmem:[#allocation7 + $0x2f0] sm:$0xff]  ;;  %v473_v4 = vld [vmem:[#allocation7 + $0x98] sm:$0xff]  ;;  %433 = vst [vmem:[#allocation2 + $0x50] sm:$0x3f] %v429_v6 }
  0x33   : > { %666 = vmatpush.msra.mxu2 %v565_v38  ;;  %609 = vmatpush.msra.mxu0 %v466_v41  ;;  %v1870_v1 = vld [vmem:[%s1843_s13 + $0x12] sm:$0xff]  ;;  %v596_v3 = vld [vmem:[#allocation7 + $0x470] sm:$0xff]  ;;  %v437_v7 = vld [vmem:[%s1843_s13 + $0x1a] sm:$0x3f] }
  0x34   : > { %638 = vmatpush.msra.mxu1 %v514_v42  ;;  %692 = vmatpush.msra.mxu3 %v479_v55  ;;  %v421_v5 = vld [vmem:[%s1843_s13 + $0x18] sm:$0x3f]  ;;  %v545_v8 = vld [vmem:[#allocation7 + $0x2d8] sm:$0xff]  ;;  %441 = vst [vmem:[#allocation2 + $0x10] sm:$0x3f] %v437_v7  ;;  %v536_v19 = vld [vmem:[#allocation7 + $0x290] sm:$0xff] }
  0x35   : > { %667 = vmatpush.msra.mxu2 %v562_v43  ;;  %610 = vmatpush.msra.mxu0 %v463_v45  ;;  %v593_v9 = vld [vmem:[#allocation7 + $0x458] sm:$0xff]  ;;  %425 = vst [vmem:[#allocation2 + $0x48] sm:$0x3f] %v421_v5  ;;  %v470_v11 = vld [vmem:[#allocation7 + $0x80] sm:$0xff]  ;;  %v467_v15 = vld [vmem:[#allocation7 + $0x68] sm:$0xff]  ;;  %s1411_s13 = sshll.u32 %s412_s12, 4  ;;  %s1412_s13 = int_to_ptr.vmem [resolvable:$true] %s1411_s13 }
  0x36   : > { %639 = vmatpush.msra.mxu1 %v511_v46  ;;  %693 = vmatpush.msra.mxu3 %v476_v59  ;;  %v501_v10 = vld [vmem:[#allocation7 + $0x178] sm:$0xff]  ;;  %v498_v12 = vld [vmem:[#allocation7 + $0x160] sm:$0xff]  ;;  %v495_v16 = vld [vmem:[#allocation7 + $0x148] sm:$0xff] }
  0x37   : > { %668 = vmatpush.msra.mxu2 %v559_v48  ;;  %611 = vmatpush.msra.mxu0 %v460_v51  ;;  %v542_v13 = vld [vmem:[#allocation7 + $0x2c0] sm:$0xff]  ;;  %v539_v17 = vld [vmem:[#allocation7 + $0x2a8] sm:$0xff]  ;;  %v584_v20 = vld [vmem:[#allocation7 + $0x410] sm:$0xff] }
  0x38   : > { %640 = vmatpush.msra.mxu1 %v508_v52  ;;  %v590_v14 = vld [vmem:[#allocation7 + $0x440] sm:$0xff]  ;;  %694 = vmatpush.msra.mxu3 %v473_v4  ;;  %v587_v18 = vld [vmem:[#allocation7 + $0x428] sm:$0xff]  ;;  %v464_v21 = vld [vmem:[#allocation7 + $0x50] sm:$0xff] }
  0x39   : > { %669 = vmatpush.msra.mxu2 %v556_v54  ;;  %612 = vmatpush.msra.mxu0 %v457_v56  ;;  %v533_v22 = vld [vmem:[#allocation7 + $0x278] sm:$0xff]  ;;  %v492_v23 = vld [vmem:[#allocation7 + $0x130] sm:$0xff]  ;;  %v530_v26 = vld [vmem:[#allocation7 + $0x260] sm:$0xff] }
  0x3a   : > { %641 = vmatpush.msra.mxu1 %v505_v57  ;;  %695 = vmatpush.msra.mxu3 %v470_v11  ;;  %v581_v24 = vld [vmem:[#allocation7 + $0x3f8] sm:$0xff]  ;;  %v578_v28 = vld [vmem:[#allocation7 + $0x3e0] sm:$0xff]  ;;  %v527_v30 = vld [vmem:[#allocation7 + $0x248] sm:$0xff] }
  0x3b   : > { %670 = vmatpush.msra.mxu2 %v553_v58  ;;  %613 = vmatpush.msra.mxu0 %v454_v61  ;;  %v461_v25 = vld [vmem:[#allocation7 + $0x38] sm:$0xff]  ;;  %v458_v29 = vld [vmem:[#allocation7 + $0x20] sm:$0xff]  ;;  %v524_v32 = vld [vmem:[#allocation7 + $0x230] sm:$0xff] }
  0x3c   : > { %642 = vmatpush.msra.mxu1 %v502_v62  ;;  %614 = vmatmul.f32.vlgmr.msra.gmra.mxu0 %v1846_v34  ;;  %v489_v27 = vld [vmem:[#allocation7 + $0x118] sm:$0xff]  ;;  %v486_v31 = vld [vmem:[#allocation7 + $0x100] sm:$0xff]  ;;  %v575_v33 = vld [vmem:[#allocation7 + $0x3c8] sm:$0xff] }
  0x3d   : > { %671 = vmatpush.msra.mxu2 %v550_v0  ;;  %643 = vmatmul.f32.vlgmr.msra.gmra.mxu1 %v1849_v37  ;;  %v455_v35 = vld [vmem:[#allocation7 + $0x8] sm:$0xff]  ;;  %v521_v36 = vld [vmem:[#allocation7 + $0x218] sm:$0xff]  ;;  %v572_v38 = vld [vmem:[#allocation7 + $0x3b0] sm:$0xff] }
  0x3e   : > { %672 = vmatmul.f32.vlgmr.msra.gmra.mxu2 %v1852_v39  ;;  %714 = vmatpush.msrb.mxu0 %v548_v2  ;;  %v549_v40 = vld [vmem:[#allocation7 + $0x2f8] sm:$0xff]  ;;  %v518_v41 = vld [vmem:[#allocation7 + $0x200] sm:$0xff]  ;;  %v483_v42 = vld [vmem:[#allocation7 + $0xe8] sm:$0xff] }
  0x3f   : > { %743 = vmatpush.msrb.mxu1 %v596_v3  ;;  %772 = vmatpush.msrb.mxu2 %v501_v10  ;;  %v569_v43 = vld [vmem:[#allocation7 + $0x398] sm:$0xff]  ;;  %v546_v44 = vld [vmem:[#allocation7 + $0x2e0] sm:$0xff]  ;;  %v515_v45 = vld [vmem:[#allocation7 + $0x1e8] sm:$0xff] }
  0x40   : > { %715 = vmatpush.msrb.mxu0 %v545_v8  ;;  %696 = vmatpush.msra.mxu3 %v467_v15  ;;  %v480_v46 = vld [vmem:[#allocation7 + $0xd0] sm:$0xff]  ;;  %v566_v48 = vld [vmem:[#allocation7 + $0x380] sm:$0xff]  ;;  %v563_v55 = vld [vmem:[#allocation7 + $0x368] sm:$0xff] }
  0x41   : > { %744 = vmatpush.msrb.mxu1 %v593_v9  ;;  %773 = vmatpush.msrb.mxu2 %v498_v12  ;;  %v1885_v49 = vld [vmem:[#allocation2 + $0x48] sm:$0x3f]  ;;  %v1887_v51 = vld [vmem:[#allocation2 + $0x50] sm:$0x3f]  ;;  %v512_v54 = vld [vmem:[#allocation7 + $0x1d0] sm:$0xff] }
  0x42   : > { %716 = vmatpush.msrb.mxu0 %v542_v13  ;;  %697 = vmatpush.msra.mxu3 %v464_v21  ;;  %v1889_v52 = vld [vmem:[#allocation2 + $0x10] sm:$0x3f]  ;;  %v477_v57 = vld [vmem:[#allocation7 + $0xb8] sm:$0xff]  ;;  %v560_v59 = vld [vmem:[#allocation7 + $0x350] sm:$0xff] }
  0x43   : > { %745 = vmatpush.msrb.mxu1 %v590_v14  ;;  %774 = vmatpush.msrb.mxu2 %v495_v16  ;;  %v543_v56 = vld [vmem:[#allocation7 + $0x2c8] sm:$0xff]  ;;  %v509_v58 = vld [vmem:[#allocation7 + $0x1b8] sm:$0xff]  ;;  %v540_v61 = vld [vmem:[#allocation7 + $0x2b0] sm:$0xff] }
  0x44   : > { %717 = vmatpush.msrb.mxu0 %v539_v17  ;;  %698 = vmatpush.msra.mxu3 %v461_v25  ;;  %v474_v62 = vld [vmem:[#allocation7 + $0xa0] sm:$0xff]  ;;  %v557_v2 = vld [vmem:[#allocation7 + $0x338] sm:$0xff]  ;;  %v471_v3 = vld [vmem:[#allocation7 + $0x88] sm:$0xff] }
  0x45   : > { %746 = vmatpush.msrb.mxu1 %v587_v18  ;;  %617 = vmatmul.f32.gmra.mxu0 %v1855_v47  ;;  %v506_v0 = vld [vmem:[#allocation7 + $0x1a0] sm:$0xff]  ;;  %v503_v4 = vld [vmem:[#allocation7 + $0x188] sm:$0xff]  ;;  %v537_v6 = vld [vmem:[#allocation7 + $0x298] sm:$0xff] }
  0x46   : > { %646 = vmatmul.f32.gmra.mxu1 %v1858_v50  ;;  %675 = vmatmul.f32.gmra.mxu2 %v1861_v53  ;;  %v554_v5 = vld [vmem:[#allocation7 + $0x320] sm:$0xff]  ;;  %v597_v7 = vld [vmem:[#allocation7 + $0x478] sm:$0xff]  ;;  %v551_v8 = vld [vmem:[#allocation7 + $0x308] sm:$0xff] }
  0x47   : > { %718 = vmatpush.msrb.mxu0 %v536_v19  ;;  %747 = vmatpush.msrb.mxu1 %v584_v20  ;;  %v534_v9 = vld [vmem:[#allocation7 + $0x280] sm:$0xff]  ;;  %v468_v11 = vld [vmem:[#allocation7 + $0x70] sm:$0xff]  ;;  %v531_v12 = vld [vmem:[#allocation7 + $0x268] sm:$0xff] }
  0x48   : > { %775 = vmatpush.msrb.mxu2 %v492_v23  ;;  %699 = vmatpush.msra.mxu3 %v458_v29  ;;  %v594_v10 = vld [vmem:[#allocation7 + $0x460] sm:$0xff]  ;;  %v591_v13 = vld [vmem:[#allocation7 + $0x448] sm:$0xff]  ;;  %v465_v14 = vld [vmem:[#allocation7 + $0x58] sm:$0xff] }
  0x49   : > { %719 = vmatpush.msrb.mxu0 %v533_v22  ;;  %748 = vmatpush.msrb.mxu1 %v581_v24  ;;  %v528_v15 = vld [vmem:[#allocation7 + $0x250] sm:$0xff]  ;;  %v525_v17 = vld [vmem:[#allocation7 + $0x238] sm:$0xff]  ;;  %v462_v19 = vld [vmem:[#allocation7 + $0x40] sm:$0xff] }
  0x4a   : > { %776 = vmatpush.msrb.mxu2 %v489_v27  ;;  %700 = vmatpush.msra.mxu3 %v455_v35  ;;  %v588_v16 = vld [vmem:[#allocation7 + $0x430] sm:$0xff]  ;;  %v585_v18 = vld [vmem:[#allocation7 + $0x418] sm:$0xff]  ;;  %v522_v20 = vld [vmem:[#allocation7 + $0x220] sm:$0xff] }
  0x4b   : > { %720 = vmatpush.msrb.mxu0 %v530_v26  ;;  %749 = vmatpush.msrb.mxu1 %v578_v28  ;;  %v582_v21 = vld [vmem:[#allocation7 + $0x400] sm:$0xff]  ;;  %v459_v22 = vld [vmem:[#allocation7 + $0x28] sm:$0xff]  ;;  %v456_v25 = vld [vmem:[#allocation7 + $0x10] sm:$0xff] }
  0x4c   : > { %777 = vmatpush.msrb.mxu2 %v486_v31  ;;  %701 = vmatmul.f32.vlgmr.msra.gmra.mxu3 %v1846_v34  ;;  %v519_v23 = vld [vmem:[#allocation7 + $0x208] sm:$0xff]  ;;  %v516_v26 = vld [vmem:[#allocation7 + $0x1f0] sm:$0xff]  ;;  %v513_v28 = vld [vmem:[#allocation7 + $0x1d8] sm:$0xff] }
  0x4d   : > { %721 = vmatpush.msrb.mxu0 %v527_v30  ;;  %750 = vmatpush.msrb.mxu1 %v575_v33  ;;  %v579_v24 = vld [vmem:[#allocation7 + $0x3e8] sm:$0xff]  ;;  %v576_v27 = vld [vmem:[#allocation7 + $0x3d0] sm:$0xff]  ;;  %v573_v29 = vld [vmem:[#allocation7 + $0x3b8] sm:$0xff] }
  0x4e   : > { %620 = vmatmul.f32.gmra.mxu0 %v1864_v60  ;;  %649 = vmatmul.f32.gmra.mxu1 %v1867_v63  ;;  %v510_v30 = vld [vmem:[#allocation7 + $0x1c0] sm:$0xff]  ;;  %v567_v33 = vld [vmem:[#allocation7 + $0x388] sm:$0xff]  ;;  %v504_v35 = vld [vmem:[#allocation7 + $0x190] sm:$0xff] }
  0x4f   : > { %678 = vmatmul.f32.gmra.mxu2 %v1870_v1  ;;  %722 = vmatpush.msrb.mxu0 %v524_v32  ;;  %v570_v31 = vld [vmem:[#allocation7 + $0x3a0] sm:$0xff]  ;;  %v507_v32 = vld [vmem:[#allocation7 + $0x1a8] sm:$0xff] }
  0x50   : > { %751 = vmatpush.msrb.mxu1 %v572_v38  ;;  %801 = vmatpush.msrb.mxu3 %v549_v40  ;;  %v558_v38 = vld [vmem:[#allocation7 + $0x340] sm:$0xff]  ;;  %v555_v40 = vld [vmem:[#allocation7 + $0x328] sm:$0xff] }
  0x51   : > { %723 = vmatpush.msrb.mxu0 %v521_v36  ;;  %778 = vmatpush.msrb.mxu2 %v483_v42  ;;  %v564_v36 = vld [vmem:[#allocation7 + $0x370] sm:$0xff]  ;;  %v946_v42 = vld [vmem:[#allocation10 + $0x120] sm:$0xff] }
  0x52   : > { %752 = vmatpush.msrb.mxu1 %v569_v43  ;;  %802 = vmatpush.msrb.mxu3 %v546_v44 }
  0x53   : > { %724 = vmatpush.msrb.mxu0 %v518_v41  ;;  %779 = vmatpush.msrb.mxu2 %v480_v46  ;;  %v552_v41 = vld [vmem:[#allocation7 + $0x310] sm:$0xff]  ;;  %v937_v46 = vld [vmem:[#allocation10 + $0xd8] sm:$0xff] }
  0x54   : > { %753 = vmatpush.msrb.mxu1 %v566_v48  ;;  %803 = vmatpush.msrb.mxu3 %v543_v56  ;;  %v953_v48 = vld [vmem:[#allocation10 + $0x158] sm:$0xff] }
  0x55   : > { %725 = vmatpush.msrb.mxu0 %v515_v45  ;;  %780 = vmatpush.msrb.mxu2 %v477_v57  ;;  %v956_v45 = vld [vmem:[#allocation10 + $0x170] sm:$0xff]  ;;  %v1003_v57 = vld [vmem:[#allocation10 + $0x2e8] sm:$0xff] }
  0x56   : > { %623 = vmatmul.f32.gmra.mxu0 %v1885_v49  ;;  %652 = vmatmul.f32.gmra.mxu1 %v1887_v51 }
  0x57   : > { %681 = vmatmul.f32.gmra.mxu2 %v1889_v52  ;;  %726 = vmatpush.msrb.mxu0 %v512_v54  ;;  %v947_v54 = vld [vmem:[#allocation10 + $0x128] sm:$0xff] }
  0x58   : > { %754 = vmatpush.msrb.mxu1 %v563_v55  ;;  %804 = vmatpush.msrb.mxu3 %v540_v61  ;;  %v928_v55 = vld [vmem:[#allocation10 + $0x90] sm:$0xff] }
  0x59   : > { %727 = vmatpush.msrb.mxu0 %v509_v58  ;;  %781 = vmatpush.msrb.mxu2 %v474_v62  ;;  %v1051_v58 = vld [vmem:[#allocation10 + $0x468] sm:$0xff]  ;;  %v925_v62 = vld [vmem:[#allocation10 + $0x78] sm:$0xff] }
  0x5a   : > { %755 = vmatpush.msrb.mxu1 %v560_v59  ;;  %704 = vmatmul.f32.gmra.mxu3 %v1855_v47  ;;  %v944_v59 = vld [vmem:[#allocation10 + $0x110] sm:$0xff] }
  0x5b   : > { %728 = vmatpush.msrb.mxu0 %v506_v0  ;;  %782 = vmatpush.msrb.mxu2 %v471_v3  ;;  %v1048_v3 = vld [vmem:[#allocation10 + $0x450] sm:$0xff] }
  0x5c   : > { %756 = vmatpush.msrb.mxu1 %v557_v2  ;;  %805 = vmatpush.msrb.mxu3 %v537_v6  ;;  %v1000_v2 = vld [vmem:[#allocation10 + $0x2d0] sm:$0xff]  ;;  %v922_v6 = vld [vmem:[#allocation10 + $0x60] sm:$0xff] }
  0x5d   : > { %729 = vmatpush.msrb.mxu0 %v503_v4  ;;  %783 = vmatpush.msrb.mxu2 %v468_v11  ;;  %v941_v4 = vld [vmem:[#allocation10 + $0xf8] sm:$0xff]  ;;  %v994_v11 = vld [vmem:[#allocation10 + $0x2a0] sm:$0xff] }
  0x5e   : > { %757 = vmatpush.msrb.mxu1 %v554_v5  ;;  %730 = vmatmul.f32.vlgmr.msrb.gmra.mxu0 %v1849_v37 }
  0x5f   : > { %830 = vmatpush.msra.mxu0 %v597_v7  ;;  %806 = vmatpush.msrb.mxu3 %v534_v9  ;;  %v997_v7 = vld [vmem:[#allocation10 + $0x2b8] sm:$0xff]  ;;  %v938_v9 = vld [vmem:[#allocation10 + $0xe0] sm:$0xff] }
  0x60   : > { %758 = vmatpush.msrb.mxu1 %v551_v8  ;;  %784 = vmatpush.msrb.mxu2 %v465_v14  ;;  %v1045_v8 = vld [vmem:[#allocation10 + $0x438] sm:$0xff]  ;;  %v916_v14 = vld [vmem:[#allocation10 + $0x30] sm:$0xff] }
  0x61   : > { %759 = vmatmul.f32.vlgmr.msrb.gmra.mxu1 %v1852_v39  ;;  %831 = vmatpush.msra.mxu0 %v594_v10  ;;  %v919_v10 = vld [vmem:[#allocation10 + $0x48] sm:$0xff] }
  0x62   : > { %807 = vmatpush.msrb.mxu3 %v531_v12  ;;  %785 = vmatpush.msrb.mxu2 %v462_v19  ;;  %v1042_v12 = vld [vmem:[#allocation10 + $0x420] sm:$0xff]  ;;  %v913_v19 = vld [vmem:[#allocation10 + $0x18] sm:$0xff] }
  0x63   : > { %832 = vmatpush.msra.mxu0 %v591_v13  ;;  %707 = vmatmul.f32.gmra.mxu3 %v1864_v60  ;;  %v935_v13 = vld [vmem:[#allocation10 + $0xc8] sm:$0xff] }
  0x64   : > { %808 = vmatpush.msrb.mxu3 %v528_v15  ;;  %786 = vmatpush.msrb.mxu2 %v459_v22  ;;  %v991_v15 = vld [vmem:[#allocation10 + $0x288] sm:$0xff]  ;;  %v929_v22 = vld [vmem:[#allocation10 + $0x98] sm:$0xff] }
  0x65   : > { %833 = vmatpush.msra.mxu0 %v588_v16  ;;  %v1039_v16 = vld [vmem:[#allocation10 + $0x408] sm:$0xff] }
  0x66   : > { %733 = vmatmul.f32.gmra.mxu0 %v1858_v50  ;;  %809 = vmatpush.msrb.mxu3 %v525_v17  ;;  %v932_v17 = vld [vmem:[#allocation10 + $0xb0] sm:$0xff] }
  0x67   : > { %834 = vmatpush.msra.mxu0 %v585_v18  ;;  %787 = vmatpush.msrb.mxu2 %v456_v25 }
  0x68   : > { %810 = vmatpush.msrb.mxu3 %v522_v20  ;;  %788 = vmatmul.f32.vlgmr.msrb.gmra.mxu2 %v1846_v34  ;;  %v561_v34 = vld [vmem:[#allocation7 + $0x358] sm:$0xff]  ;;  %v988_v20 = vld [vmem:[#allocation10 + $0x270] sm:$0xff] }
  0x69   : > { %762 = vmatmul.f32.gmra.mxu1 %v1861_v53  ;;  %835 = vmatpush.msra.mxu0 %v582_v21  ;;  %v1036_v21 = vld [vmem:[#allocation10 + $0x3f0] sm:$0xff] }
  0x6a   : > { %811 = vmatpush.msrb.mxu3 %v519_v23  ;;  %1074 = vmatpush.msra.mxu2 %v1003_v57  ;;  %v989_v57 = vld [vmem:[#allocation10 + $0x278] sm:$0xff] }
  0x6b   : > { %836 = vmatpush.msra.mxu0 %v579_v24  ;;  %710 = vmatmul.f32.gmra.mxu3 %v1885_v49  ;;  %v910_v24 = vld [vmem:[#allocation10] sm:$0xff] }
  0x6c   : > { %812 = vmatpush.msrb.mxu3 %v516_v26  ;;  %1075 = vmatpush.msra.mxu2 %v1000_v2  ;;  %v985_v26 = vld [vmem:[#allocation10 + $0x258] sm:$0xff]  ;;  %v986_v2 = vld [vmem:[#allocation10 + $0x260] sm:$0xff] }
  0x6d   : > { %837 = vmatpush.msra.mxu0 %v576_v27  ;;  %v1033_v27 = vld [vmem:[#allocation10 + $0x3d8] sm:$0xff] }
  0x6e   : > { %736 = vmatmul.f32.gmra.mxu0 %v1867_v63  ;;  %813 = vmatpush.msrb.mxu3 %v513_v28  ;;  %v926_v28 = vld [vmem:[#allocation10 + $0x80] sm:$0xff] }
  0x6f   : > { %838 = vmatpush.msra.mxu0 %v573_v29  ;;  %1076 = vmatpush.msra.mxu2 %v997_v7  ;;  %v1012_v7 = vld [vmem:[#allocation10 + $0x330] sm:$0xff] }
  0x70   : > { %814 = vmatpush.msrb.mxu3 %v510_v30  ;;  %791 = vmatmul.f32.gmra.mxu2 %v1855_v47  ;;  %v955_v47 = vld [vmem:[#allocation10 + $0x168] sm:$0xff]  ;;  %v1004_v30 = vld [vmem:[#allocation10 + $0x2f0] sm:$0xff] }
  0x71   : > { %765 = vmatmul.f32.gmra.mxu1 %v1870_v1  ;;  %839 = vmatpush.msra.mxu0 %v570_v31  ;;  %v982_v31 = vld [vmem:[#allocation10 + $0x240] sm:$0xff] }
  0x72   : > { %815 = vmatpush.msrb.mxu3 %v507_v32  ;;  %1054 = vmatpush.msra.mxu1 %v955_v47  ;;  %v1030_v32 = vld [vmem:[#allocation10 + $0x3c0] sm:$0xff]  ;;  %v976_v47 = vld [vmem:[#allocation10 + $0x210] sm:$0xff] }
  0x73   : > { %840 = vmatpush.msra.mxu0 %v567_v33  ;;  %1077 = vmatpush.msra.mxu2 %v994_v11  ;;  %v923_v33 = vld [vmem:[#allocation10 + $0x68] sm:$0xff]  ;;  %v1009_v11 = vld [vmem:[#allocation10 + $0x318] sm:$0xff] }
  0x74   : > { %816 = vmatpush.msrb.mxu3 %v504_v35  ;;  %v1001_v35 = vld [vmem:[#allocation10 + $0x2d8] sm:$0xff] }
  0x75   : > { %841 = vmatpush.msra.mxu0 %v564_v36  ;;  %817 = vmatmul.f32.vlgmr.msrb.gmra.mxu3 %v1849_v37  ;;  %v979_v36 = vld [vmem:[#allocation10 + $0x228] sm:$0xff] }
  0x76   : > { %739 = vmatmul.f32.gmra.mxu0 %v1887_v51  ;;  %1094 = vmatpush.msra.mxu3 %v1051_v58  ;;  %v1005_v58 = vld [vmem:[#allocation10 + $0x2f8] sm:$0xff] }
  0x77   : > { %842 = vmatpush.msra.mxu0 %v561_v34  ;;  %1078 = vmatpush.msra.mxu2 %v991_v15  ;;  %v1027_v34 = vld [vmem:[#allocation10 + $0x3a8] sm:$0xff] }
  0x78   : > { %794 = vmatmul.f32.gmra.mxu2 %v1864_v60  ;;  %v952_v60 = vld [vmem:[#allocation10 + $0x150] sm:$0xff]  ;;  %1095 = vmatpush.msra.mxu3 %v1048_v3 }
  0x79   : > { %768 = vmatmul.f32.gmra.mxu1 %v1889_v52  ;;  %843 = vmatpush.msra.mxu0 %v558_v38  ;;  %v920_v38 = vld [vmem:[#allocation10 + $0x50] sm:$0xff] }
  0x7a   : > { %1055 = vmatpush.msra.mxu1 %v952_v60  ;;  %1096 = vmatpush.msra.mxu3 %v1045_v8  ;;  %v1024_v60 = vld [vmem:[#allocation10 + $0x390] sm:$0xff]  ;;  %v983_v8 = vld [vmem:[#allocation10 + $0x248] sm:$0xff] }
  0x7b   : > { %844 = vmatpush.msra.mxu0 %v555_v40  ;;  %1079 = vmatpush.msra.mxu2 %v988_v20  ;;  %v977_v20 = vld [vmem:[#allocation10 + $0x218] sm:$0xff] }
  0x7c   : > { %1097 = vmatpush.msra.mxu3 %v1042_v12  ;;  %v980_v12 = vld [vmem:[#allocation10 + $0x230] sm:$0xff] }
  0x7d   : > { %845 = vmatpush.msra.mxu0 %v552_v41  ;;  %820 = vmatmul.f32.gmra.mxu3 %v1858_v50  ;;  %v998_v41 = vld [vmem:[#allocation10 + $0x2c0] sm:$0xff] }
  0x7e   : > { %846 = vmatmul.f32.vlgmr.msra.gmra.mxu0 %v1852_v39  ;;  %v949_v39 = vld [vmem:[#allocation10 + $0x138] sm:$0xff]  ;;  %1098 = vmatpush.msra.mxu3 %v1039_v16 }
  0x7f   : > { %1056 = vmatpush.msra.mxu1 %v949_v39  ;;  %1114 = vmatpush.msrb.mxu0 %v956_v45  ;;  %v917_v39 = vld [vmem:[#allocation10 + $0x38] sm:$0xff]  ;;  %v914_v45 = vld [vmem:[#allocation10 + $0x20] sm:$0xff] }
  0x80   : > { %797 = vmatmul.f32.gmra.mxu2 %v1885_v49  ;;  %v934_v49 = vld [vmem:[#allocation10 + $0xc0] sm:$0xff]  ;;  %1099 = vmatpush.msra.mxu3 %v1036_v21  ;;  %v1052_v21 = vld [vmem:[#allocation10 + $0x470] sm:$0xff] }
  0x81   : > { %1057 = vmatpush.msra.mxu1 %v946_v42  ;;  %1115 = vmatpush.msrb.mxu0 %v953_v48  ;;  %v995_v42 = vld [vmem:[#allocation10 + $0x2a8] sm:$0xff]  ;;  %v992_v48 = vld [vmem:[#allocation10 + $0x290] sm:$0xff] }
  0x82   : > { %1080 = vmatpush.msra.mxu2 %v985_v26  ;;  %1100 = vmatpush.msra.mxu3 %v1033_v27  ;;  %v974_v26 = vld [vmem:[#allocation10 + $0x200] sm:$0xff] }
  0x84   : > { %1081 = vmatpush.msra.mxu2 %v982_v31  ;;  %1101 = vmatpush.msra.mxu3 %v1030_v32  ;;  %v990_v31 = vld [vmem:[#allocation10 + $0x280] sm:$0xff] }
  0x85   : > { %823 = vmatmul.f32.gmra.mxu3 %v1867_v63  ;;  %v943_v63 = vld [vmem:[#allocation10 + $0x108] sm:$0xff] }
  0x86   : > { %849 = vmatmul.f32.gmra.mxu0 %v1861_v53  ;;  %1058 = vmatpush.msra.mxu1 %v943_v63  ;;  %v940_v53 = vld [vmem:[#allocation10 + $0xf0] sm:$0xff]  ;;  %v973_v63 = vld [vmem:[#allocation10 + $0x1f8] sm:$0xff] }
  0x87   : > { %1082 = vmatpush.msra.mxu2 %v979_v36  ;;  %1102 = vmatpush.msra.mxu3 %v1027_v34  ;;  %v951_v36 = vld [vmem:[#allocation10 + $0x148] sm:$0xff] }
  0x88   : > { %1059 = vmatpush.msra.mxu1 %v940_v53  ;;  %v1021_v53 = vld [vmem:[#allocation10 + $0x378] sm:$0xff]  ;;  %v987_v34 = vld [vmem:[#allocation10 + $0x268] sm:$0xff] }
  0x89   : > { %1083 = vmatpush.msra.mxu2 %v976_v47  ;;  %1103 = vmatpush.msra.mxu3 %v1024_v60  ;;  %v948_v47 = vld [vmem:[#allocation10 + $0x130] sm:$0xff] }
  0x8a   : > { %1060 = vmatpush.msra.mxu1 %v937_v46  ;;  %v984_v60 = vld [vmem:[#allocation10 + $0x250] sm:$0xff] }
  0x8b   : > { %1084 = vmatpush.msra.mxu2 %v973_v63  ;;  %1104 = vmatpush.msra.mxu3 %v1021_v53  ;;  %v1040_v63 = vld [vmem:[#allocation10 + $0x410] sm:$0xff]  ;;  %v945_v53 = vld [vmem:[#allocation10 + $0x118] sm:$0xff] }
  0x8c   : > { %1061 = vmatpush.msra.mxu1 %v934_v49 }
  0x8d   : > { %826 = vmatmul.f32.gmra.mxu3 %v1887_v51  ;;  %v950_v51 = vld [vmem:[#allocation10 + $0x140] sm:$0xff] }
  0x8e   : > { %852 = vmatmul.f32.gmra.mxu0 %v1870_v1 }
  0x8f   : > { %1116 = vmatpush.msrb.mxu0 %v950_v51 }
  0x91   : > { %1117 = vmatpush.msrb.mxu0 %v947_v54  ;;  %v1018_v54 = vld [vmem:[#allocation10 + $0x360] sm:$0xff] }
  0x92   : > { %1105 = vmatpush.msra.mxu3 %v1018_v54  ;;  %v962_v54 = vld [vmem:[#allocation10 + $0x1a0] sm:$0xff] }
  0x93   : > { %1118 = vmatpush.msrb.mxu0 %v944_v59  ;;  %v967_v59 = vld [vmem:[#allocation10 + $0x1c8] sm:$0xff] }
  0x95   : > { %1119 = vmatpush.msrb.mxu0 %v941_v4  ;;  %v1002_v4 = vld [vmem:[#allocation10 + $0x2e0] sm:$0xff] }
  0x96   : > { %855 = vmatmul.f32.gmra.mxu0 %v1889_v52  ;;  %v931_v52 = vld [vmem:[#allocation10 + $0xa8] sm:$0xff] }
  0x97   : > { %1062 = vmatpush.msra.mxu1 %v931_v52  ;;  %1120 = vmatpush.msrb.mxu0 %v938_v9  ;;  %v970_v52 = vld [vmem:[#allocation10 + $0x1e0] sm:$0xff]  ;;  %v999_v9 = vld [vmem:[#allocation10 + $0x2c8] sm:$0xff] }
  0x98   : > { %1085 = vmatpush.msra.mxu2 %v970_v52  ;;  %v981_v52 = vld [vmem:[#allocation10 + $0x238] sm:$0xff] }
  0x99   : > { %1063 = vmatpush.msra.mxu1 %v928_v55  ;;  %1121 = vmatpush.msrb.mxu0 %v935_v13  ;;  %v911_v55 = vld [vmem:[#allocation10 + $0x8] sm:$0xff] }
  0x9a   : > { %1086 = vmatpush.msra.mxu2 %v967_v59  ;;  %v978_v59 = vld [vmem:[#allocation10 + $0x220] sm:$0xff] }
  0x9b   : > { %1064 = vmatpush.msra.mxu1 %v925_v62  ;;  %1122 = vmatpush.msrb.mxu0 %v932_v17  ;;  %v1015_v62 = vld [vmem:[#allocation10 + $0x348] sm:$0xff]  ;;  %v958_v17 = vld [vmem:[#allocation10 + $0x180] sm:$0xff] }
  0x9c   : > { %1106 = vmatpush.msra.mxu3 %v1015_v62  ;;  %v959_v62 = vld [vmem:[#allocation10 + $0x188] sm:$0xff] }
  0x9d   : > { %1065 = vmatpush.msra.mxu1 %v922_v6  ;;  %1123 = vmatpush.msrb.mxu0 %v929_v22  ;;  %v964_v6 = vld [vmem:[#allocation10 + $0x1b0] sm:$0xff]  ;;  %v957_v22 = vld [vmem:[#allocation10 + $0x178] sm:$0xff] }
  0x9e   : > { %1087 = vmatpush.msra.mxu2 %v964_v6  ;;  %1107 = vmatpush.msra.mxu3 %v1012_v7  ;;  %v939_v7 = vld [vmem:[#allocation10 + $0xe8] sm:$0xff] }
  0x9f   : > { %1066 = vmatpush.msra.mxu1 %v919_v10  ;;  %1124 = vmatpush.msrb.mxu0 %v926_v28  ;;  %v961_v10 = vld [vmem:[#allocation10 + $0x198] sm:$0xff] }
  0xa0   : > { %1088 = vmatpush.msra.mxu2 %v961_v10  ;;  %1108 = vmatpush.msra.mxu3 %v1009_v11  ;;  %v1049_v28 = vld [vmem:[#allocation10 + $0x458] sm:$0xff]  ;;  %v1031_v10 = vld [vmem:[#allocation10 + $0x3c8] sm:$0xff]  ;;  %v936_v11 = vld [vmem:[#allocation10 + $0xd0] sm:$0xff] }
  0xa1   : > { %1067 = vmatpush.msra.mxu1 %v916_v14  ;;  %1125 = vmatpush.msrb.mxu0 %v923_v33  ;;  %v996_v14 = vld [vmem:[#allocation10 + $0x2b0] sm:$0xff]  ;;  %v971_v33 = vld [vmem:[#allocation10 + $0x1e8] sm:$0xff] }
  0xa2   : > { %1089 = vmatpush.msra.mxu2 %v958_v17  ;;  %v933_v17 = vld [vmem:[#allocation10 + $0xb8] sm:$0xff] }
  0xa3   : > { %1068 = vmatpush.msra.mxu1 %v913_v19  ;;  %1126 = vmatpush.msrb.mxu0 %v920_v38  ;;  %v1006_v19 = vld [vmem:[#allocation10 + $0x300] sm:$0xff]  ;;  %v968_v38 = vld [vmem:[#allocation10 + $0x1d0] sm:$0xff] }
  0xa4   : > { %1109 = vmatpush.msra.mxu3 %v1006_v19  ;;  %1154 = vmatpush.msrb.mxu2 %v1052_v21  ;;  %v969_v19 = vld [vmem:[#allocation10 + $0x1d8] sm:$0xff] }
  0xa5   : > { %1069 = vmatpush.msra.mxu1 %v910_v24  ;;  %1127 = vmatpush.msrb.mxu0 %v917_v39  ;;  %v993_v24 = vld [vmem:[#allocation10 + $0x298] sm:$0xff] }
  0xa6   : > { %1174 = vmatpush.msrb.mxu3 %v957_v22  ;;  %1155 = vmatpush.msrb.mxu2 %v1049_v28 }
  0xa7   : > { %1134 = vmatpush.msrb.mxu1 %v1004_v30  ;;  %1128 = vmatpush.msrb.mxu0 %v914_v45  ;;  %v954_v30 = vld [vmem:[#allocation10 + $0x160] sm:$0xff] }
  0xa8   : > { %1175 = vmatpush.msrb.mxu3 %v954_v30 }
  0xa9   : > { %1135 = vmatpush.msrb.mxu1 %v1001_v35  ;;  %1129 = vmatpush.msrb.mxu0 %v911_v55  ;;  %v1046_v35 = vld [vmem:[#allocation10 + $0x440] sm:$0xff] }
  0xaa   : > { %1156 = vmatpush.msrb.mxu2 %v1046_v35  ;;  %1176 = vmatpush.msrb.mxu3 %v951_v36  ;;  %v1019_v36 = vld [vmem:[#allocation10 + $0x368] sm:$0xff] }
  0xab   : > { %1136 = vmatpush.msrb.mxu1 %v998_v41  ;;  %1194 = vmatpush.msra.mxu0 %v1005_v58  ;;  %v1043_v41 = vld [vmem:[#allocation10 + $0x428] sm:$0xff]  ;;  %v1037_v58 = vld [vmem:[#allocation10 + $0x3f8] sm:$0xff] }
  0xac   : > { %1157 = vmatpush.msrb.mxu2 %v1043_v41  ;;  %1177 = vmatpush.msrb.mxu3 %v948_v47 }
  0xad   : > { %1137 = vmatpush.msrb.mxu1 %v995_v42  ;;  %1195 = vmatpush.msra.mxu0 %v1002_v4  ;;  %v965_v42 = vld [vmem:[#allocation10 + $0x1b8] sm:$0xff] }
  0xae   : > { %1158 = vmatpush.msrb.mxu2 %v1040_v63  ;;  %1178 = vmatpush.msrb.mxu3 %v945_v53 }
  0xaf   : > { %1138 = vmatpush.msrb.mxu1 %v992_v48  ;;  %1196 = vmatpush.msra.mxu0 %v999_v9 }
  0xb0   : > { %1159 = vmatpush.msrb.mxu2 %v1037_v58 }
  0xb1   : > { %1139 = vmatpush.msrb.mxu1 %v989_v57  ;;  %1197 = vmatpush.msra.mxu0 %v996_v14 }
  0xb3   : > { %1140 = vmatpush.msrb.mxu1 %v986_v2  ;;  %1198 = vmatpush.msra.mxu0 %v993_v24  ;;  %v1025_v24 = vld [vmem:[#allocation10 + $0x398] sm:$0xff] }
  0xb5   : > { %1141 = vmatpush.msrb.mxu1 %v983_v8  ;;  %1199 = vmatpush.msra.mxu0 %v990_v31  ;;  %v975_v8 = vld [vmem:[#allocation10 + $0x208] sm:$0xff] }
  0xb7   : > { %1142 = vmatpush.msrb.mxu1 %v980_v12  ;;  %1200 = vmatpush.msra.mxu0 %v987_v34  ;;  %v972_v12 = vld [vmem:[#allocation10 + $0x1f0] sm:$0xff] }
  0xb8   : > { %v924_v34 = vld [vmem:[#allocation10 + $0x70] sm:$0xff] }
  0xb9   : > { %v1917_v37 = vpop.f32.mrf.mxu0  ;;  %1143 = vmatpush.msrb.mxu1 %v977_v20  ;;  %1201 = vmatpush.msra.mxu0 %v984_v60 }
  0xba   : > { %v1921_v43 = vpop.f32.mrf.mxu1 }
  0xbb   : > { %1144 = vmatpush.msrb.mxu1 %v974_v26  ;;  %v645_v39 = vadd.f32 %v1921_v43, %v1917_v37  ;;  %v942_v37 = vld [vmem:[#allocation10 + $0x100] sm:$0xff]  ;;  %1202 = vmatpush.msra.mxu0 %v981_v52  ;;  %v915_v52 = vld [vmem:[#allocation10 + $0x28] sm:$0xff] }
  0xbc   : > { %1179 = vmatpush.msrb.mxu3 %v942_v37  ;;  %v930_v26 = vld [vmem:[#allocation10 + $0xa0] sm:$0xff] }
  0xbd   : > { %1145 = vmatpush.msrb.mxu1 %v971_v33  ;;  %1203 = vmatpush.msra.mxu0 %v978_v59  ;;  %v927_v33 = vld [vmem:[#allocation10 + $0x88] sm:$0xff] }
  0xbe   : > { %1180 = vmatpush.msrb.mxu3 %v939_v7 }
  0xbf   : > { %1146 = vmatpush.msrb.mxu1 %v968_v38  ;;  %1204 = vmatpush.msra.mxu0 %v975_v8  ;;  %v960_v38 = vld [vmem:[#allocation10 + $0x190] sm:$0xff] }
  0xc0   : > { %1181 = vmatpush.msrb.mxu3 %v936_v11 }
  0xc1   : > { %v1923_v1 = vpop.f32.mrf.mxu2  ;;  %1147 = vmatpush.msrb.mxu1 %v965_v42  ;;  %1205 = vmatpush.msra.mxu0 %v972_v12 }
  0xc2   : > { %v1919_v50 = vpop.f32.mrf.mxu0  ;;  %v674_v55 = vadd.f32 %v1923_v1, %v645_v39  ;;  %v1034_v1 = vld [vmem:[#allocation10 + $0x3e0] sm:$0xff]  ;;  %1182 = vmatpush.msrb.mxu3 %v933_v17  ;;  %v1041_v17 = vld [vmem:[#allocation10 + $0x418] sm:$0xff] }
  0xc3   : > { %v1929_v61 = vpop.f32.mrf.mxu1  ;;  %1148 = vmatpush.msrb.mxu1 %v962_v54  ;;  %1160 = vmatpush.msrb.mxu2 %v1034_v1 }
  0xc4   : > { %1206 = vmatpush.msra.mxu0 %v969_v19  ;;  %1183 = vmatpush.msrb.mxu3 %v930_v26 }
  0xc5   : > { %1149 = vmatpush.msrb.mxu1 %v959_v62  ;;  %1161 = vmatpush.msrb.mxu2 %v1031_v10  ;;  %v1053_v10 = vld [vmem:[#allocation10 + $0x478] sm:$0xff] }
  0xc6   : > { %1184 = vmatpush.msrb.mxu3 %v927_v33  ;;  %v1023_v33 = vld [vmem:[#allocation10 + $0x388] sm:$0xff] }
  0xc8   : > { %1185 = vmatpush.msrb.mxu3 %v924_v34  ;;  %v1011_v34 = vld [vmem:[#allocation10 + $0x328] sm:$0xff] }
  0xc9   : > { %v1931_v0 = vpop.f32.mrf.mxu2 }
  0xcb   : > { %v1925_v44 = vpop.f32.mrf.mxu0  ;;  %v1937_v23 = vpop.f32.mrf.mxu1 }
  0xcc   : > { %v651_v41 = vadd.f32 %v1937_v23, %v1925_v44  ;;  %v1013_v44 = vld [vmem:[#allocation10 + $0x338] sm:$0xff]  ;;  %v918_v23 = vld [vmem:[#allocation10 + $0x40] sm:$0xff] }
  0xcf   : > { %v1933_v5 = vpop.f32.mrf.mxu3 }
  0xd2   : > { %v1939_v25 = vpop.f32.mrf.mxu2 }
  0xd3   : > { %v1927_v56 = vpop.f32.mrf.mxu0  ;;  %v1945_v46 = vpop.f32.mrf.mxu1  ;;  %v680_v60 = vadd.f32 %v1939_v25, %v651_v41  ;;  %v1007_v25 = vld [vmem:[#allocation10 + $0x308] sm:$0xff] }
  0xd4   : > { %v654_v58 = vadd.f32 %v1945_v46, %v1927_v56  ;;  %v1567_v56 = vld [vmem:[%s2146_s2] ss:$0 sm:$0xff]  ;;  %v1276_v41 = vld [vmem:[%s2149_s5 + $0x78] sm:$0xff] }
  0xda   : > { %v1947_v49 = vpop.f32.mrf.mxu2 }
  0xdb   : > { %v1935_v18 = vpop.f32.mrf.mxu0 }
  0xdc   : > { %v732_v32 = vadd.f32 %v1935_v18, %v1933_v5 }
  0xdd   : > { %v1941_v29 = vpop.f32.mrf.mxu3 }
  0xde   : > { %v760_v13 = vpop.f32.mrf.mxu1 }
  0xdf   : > { %v761_v5 = vadd.f32 %v760_v13, %v732_v32  ;;  %v648_v13 = vadd.f32 %v1929_v61, %v1919_v50  ;;  %v966_v50 = vld [vmem:[#allocation10 + $0x1c0] sm:$0xff] }
  0xe0   : > { %v1022_v32 = vld [vmem:[#allocation10 + $0x380] sm:$0xff]  ;;  %1207 = vmatpush.msra.mxu0 %v966_v50 }
  0xe1   : > { %v859_v2 = vmax.f32 %v674_v55, %v761_v5  ;;  %v677_v20 = vadd.f32 %v1931_v0, %v648_v13  ;;  %v963_v0 = vld [vmem:[#allocation10 + $0x1a8] sm:$0xff]  ;;  %v1016_v5 = vld [vmem:[#allocation10 + $0x350] sm:$0xff] }
  0xe2   : > { %1208 = vmatpush.msra.mxu0 %v963_v0  ;;  %v1047_v13 = vld [vmem:[#allocation10 + $0x448] sm:$0xff]  ;;  %v1020_v0 = vld [vmem:[#allocation10 + $0x370] sm:$0xff] }
  0xe3   : > { %v1943_v40 = vpop.f32.mrf.mxu0 }
  0xe4   : > { %v735_v4 = vadd.f32 %v1943_v40, %v1941_v29  ;;  %1209 = vmatpush.msra.mxu0 %v960_v38  ;;  %v1008_v38 = vld [vmem:[#allocation10 + $0x310] sm:$0xff] }
  0xe6   : > { %v1949_v51 = vpop.f32.mrf.mxu3  ;;  %v763_v45 = vpop.f32.mrf.mxu1 }
  0xe7   : > { %v764_v29 = vadd.f32 %v763_v45, %v735_v4 }
  0xe9   : > { %v860_v61 = vmax.f32 %v677_v20, %v764_v29  ;;  %v1038_v20 = vld [vmem:[#allocation10 + $0x400] sm:$0xff] }
  0xeb   : > { %v1951_v3 = vpop.f32.mrf.mxu0  ;;  %v789_v16 = vpop.f32.mrf.mxu2 }
  0xec   : > { %v738_v28 = vadd.f32 %v1951_v3, %v1949_v51 }
  0xee   : > { %v1953_v15 = vpop.f32.mrf.mxu3  ;;  %v766_v21 = vpop.f32.mrf.mxu1 }
  0xef   : > { %v767_v47 = vadd.f32 %v766_v21, %v738_v28  ;;  %v1035_v28 = vld [vmem:[#allocation10 + $0x3e8] sm:$0xff] }
  0xf1   : > { %v861_v42 = vmax.f32 %v680_v60, %v767_v47  ;;  %v1292_v47 = vld [vmem:[%s2149_s5 + $0xf8] sm:$0xff]  ;;  %v1274_v60 = vld [vmem:[%s2149_s5 + $0x68] sm:$0xff] }
  0xf3   : > { %v1955_v27 = vpop.f32.mrf.mxu0  ;;  %v792_v57 = vpop.f32.mrf.mxu2 }
  0xf4   : > { %v741_v63 = vadd.f32 %v1955_v27, %v1953_v15 }
  0xf6   : > { %v769_v45 = vpop.f32.mrf.mxu1 }
  0xf7   : > { %v770_v37 = vadd.f32 %v769_v45, %v741_v63  ;;  %v1288_v63 = vld [vmem:[%s2149_s5 + $0xd8] sm:$0xff] }
  0xf8   : > { %v818_v18 = vpop.f32.mrf.mxu3 }
  0xf9   : > { %v819_v48 = vadd.f32 %v818_v18, %v789_v16  ;;  %v1028_v16 = vld [vmem:[#allocation10 + $0x3b0] sm:$0xff]  ;;  %v921_v18 = vld [vmem:[#allocation10 + $0x58] sm:$0xff] }
  0xfa   : > { %1162 = vmatpush.msrb.mxu2 %v1028_v16  ;;  %1186 = vmatpush.msrb.mxu3 %v921_v18  ;;  %v1289_v18 = vld [vmem:[%s2149_s5 + $0xe0] sm:$0xff] }
  0xfb   : > { %v847_v43 = vpop.f32.mrf.mxu0  ;;  %v795_v31 = vpop.f32.mrf.mxu2 }
  0xfc   : > { %v848_v6 = vadd.f32 %v847_v43, %v819_v48  ;;  %1163 = vmatpush.msrb.mxu2 %v1025_v24  ;;  %v1010_v48 = vld [vmem:[#allocation10 + $0x320] sm:$0xff]  ;;  %1187 = vmatpush.msrb.mxu3 %v918_v23  ;;  %v683_v43 = vadd.f32 %v1947_v49, %v654_v58 }
  0xfd   : > { %v1050_v49 = vld [vmem:[#allocation10 + $0x460] sm:$0xff] }
  0xfe   : > { %v863_v9 = vmax.f32 %v859_v2, %v848_v6  ;;  %1164 = vmatpush.msrb.mxu2 %v1022_v32  ;;  %1188 = vmatpush.msrb.mxu3 %v915_v52  ;;  %v862_v62 = vmax.f32 %v683_v43, %v770_v37  ;;  %v1026_v32 = vld [vmem:[#allocation10 + $0x3a0] sm:$0xff]  ;;  %v1270_v52 = vld [vmem:[%s2149_s5 + $0x48] sm:$0xff] }
  0xff   : > { %v1287_v23 = vld [vmem:[%s2149_s5 + $0xd0] sm:$0xff]  ;;  %v1284_v58 = vld [vmem:[%s2149_s5 + $0xb8] sm:$0xff] }
 0x100   : > { %867 = vst [vmem:[#allocation4] sm:$0xff] %v863_v9  ;;  %v821_v40 = vpop.f32.mrf.mxu3  ;;  %1165 = vmatpush.msrb.mxu2 %v1019_v36  ;;  %v1014_v36 = vld [vmem:[#allocation10 + $0x340] sm:$0xff] }
 0x101   : > { %v822_v14 = vadd.f32 %v821_v40, %v792_v57  ;;  %v912_v57 = vld [vmem:[#allocation10 + $0x10] sm:$0xff] }
 0x102   : > { %1166 = vmatpush.msrb.mxu2 %v1016_v5  ;;  %1189 = vmatpush.msrb.mxu3 %v912_v57  ;;  %v1273_v5 = vld [vmem:[%s2149_s5 + $0x60] sm:$0xff]  ;;  %v1268_v57 = vld [vmem:[%s2149_s5 + $0x38] sm:$0xff] }
 0x103   : > { %v850_v22 = vpop.f32.mrf.mxu0  ;;  %v798_v55 = vpop.f32.mrf.mxu2 }
 0x104   : > { %v851_v30 = vadd.f32 %v850_v22, %v822_v14  ;;  %1167 = vmatpush.msrb.mxu2 %v1013_v44  ;;  %v1044_v14 = vld [vmem:[#allocation10 + $0x430] sm:$0xff]  ;;  %v1271_v44 = vld [vmem:[%s2149_s5 + $0x50] sm:$0xff] }
 0x106   : > { %v864_v35 = vmax.f32 %v860_v61, %v851_v30  ;;  %1168 = vmatpush.msrb.mxu2 %v1010_v48  ;;  %v1032_v30 = vld [vmem:[#allocation10 + $0x3d0] sm:$0xff] }
 0x108   : > { %868 = vst [vmem:[#allocation4 + $0x8] sm:$0xff] %v864_v35  ;;  %v824_v51 = vpop.f32.mrf.mxu3  ;;  %1169 = vmatpush.msrb.mxu2 %v1007_v25  ;;  %v1017_v35 = vld [vmem:[#allocation10 + $0x358] sm:$0xff]  ;;  %v1285_v25 = vld [vmem:[%s2149_s5 + $0xc0] sm:$0xff] }
 0x109   : > { %v825_v3 = vadd.f32 %v824_v51, %v795_v31  ;;  %v1029_v31 = vld [vmem:[#allocation10 + $0x3b8] sm:$0xff] }
 0x10a   : > { %v1275_v51 = vld [vmem:[%s2149_s5 + $0x70] sm:$0xff] }
 0x10b   : > { %v853_v39 = vpop.f32.mrf.mxu0 }
 0x10c   : > { %v854_v53 = vadd.f32 %v853_v39, %v825_v3  ;;  %v1291_v3 = vld [vmem:[%s2149_s5 + $0xf0] sm:$0xff]  ;;  %v1290_v39 = vld [vmem:[%s2149_s5 + $0xe8] sm:$0xff] }
 0x10e   : > { %v865_v54 = vmax.f32 %v861_v42, %v854_v53  ;;  %v1272_v42 = vld [vmem:[%s2149_s5 + $0x58] sm:$0xff] }
 0x110   : > { %869 = vst [vmem:[#allocation4 + $0x10] sm:$0xff] %v865_v54  ;;  %v827_v15 = vpop.f32.mrf.mxu3  ;;  %v1286_v54 = vld [vmem:[%s2149_s5 + $0xc8] sm:$0xff] }
 0x111   : > { %v828_v27 = vadd.f32 %v827_v15, %v798_v55  ;;  %v1269_v55 = vld [vmem:[%s2149_s5 + $0x40] sm:$0xff]  ;;  %v1267_v15 = vld [vmem:[%s2149_s5 + $0x30] sm:$0xff] }
 0x113   : > { %v856_v59 = vpop.f32.mrf.mxu0 }
 0x114   : > { %v857_v2 = vadd.f32 %v856_v59, %v828_v27  ;;  %v1283_v27 = vld [vmem:[%s2149_s5 + $0xb0] sm:$0xff]  ;;  %v1266_v59 = vld [vmem:[%s2149_s5 + $0x28] sm:$0xff] }
 0x116   : > { %v866_v4 = vmax.f32 %v862_v62, %v857_v2  ;;  %v1282_v62 = vld [vmem:[%s2149_s5 + $0xa8] sm:$0xff] }
 0x117   : > { %v871_v6 = vld [vmem:[#allocation4] ss:$3 sm:$0xff]  ;;  %v875_v1 = vld [vmem:[#allocation4 + $0x1] ss:$3 sm:$0xff]  ;;  %v881_v46 = vld [vmem:[#allocation4 + $0x2] ss:$3 sm:$0xff] }
 0x118   : > { %870 = vst [vmem:[#allocation4 + $0x18] sm:$0x3f] %v866_v4  ;;  %v878_v7 = vmax.f32 %v871_v6, %v875_v1  ;;  %v1265_v4 = vld [vmem:[%s2149_s5 + $0x20] sm:$0xff] }
 0x119   : > { %v1281_v6 = vld [vmem:[%s2149_s5 + $0xa0] sm:$0xff] }
 0x11a   : > { %v884_v8 = vmax.f32 %v878_v7, %v881_v46  ;;  %v1264_v46 = vld [vmem:[%s2149_s5 + $0x18] sm:$0xff] }
 0x11c   : > { %v890_v9 = vadd.f32 %v1567_v56, %v884_v8  ;;  %v1280_v8 = vld [vmem:[%s2149_s5 + $0x98] sm:$0xff] }
 0x11e   : > { %1070 = vmatmul.f32.vlgmr.msra.gmra.mxu1 %v890_v9  ;;  %1130 = vmatmul.f32.vlgmr.msrb.gmra.mxu0 %v890_v9  ;;  %v896_v21 = vrot.slane %v890_v9, 1  ;;  %v902_v24 = vrot.slane %v890_v9, 2 }
 0x11f   : > { %1214 = vmatpush.msra.mxu1 %v1053_v10  ;;  %v873_v11 = vld [vmem:[#allocation4 + $0x18] ss:$3 sm:$0x3]  ;;  %v877_v12 = vld [vmem:[#allocation4 + $0x19] ss:$3 sm:$0x3] }
 0x120   : > { %v879_v29 = vmax.f32 %v873_v11, %v877_v12  ;;  %v883_v40 = vld [vmem:[#allocation4 + $0x1a] ss:$3 sm:$0x3]  ;;  %v1279_v11 = vld [vmem:[%s2149_s5 + $0x90] sm:$0xff] }
 0x121   : > { %1215 = vmatpush.msra.mxu1 %v1050_v49  ;;  %v1263_v49 = vld [vmem:[%s2149_s5 + $0x10] sm:$0xff] }
 0x122   : > { %v885_v16 = vmax.f32 %v879_v29, %v883_v40  ;;  %v1262_v40 = vld [vmem:[%s2149_s5 + $0x8] sm:$0xff] }
 0x123   : > { %1216 = vmatpush.msra.mxu1 %v1047_v13 }
 0x124   : > { %v891_v19 = vadd.f32 %v1567_v56, %v885_v16 }
 0x125   : > { %1217 = vmatpush.msra.mxu1 %v1044_v14  ;;  %v1278_v14 = vld [vmem:[%s2149_s5 + $0x88] sm:$0xff] }
 0x126   : > { %v897_v22 = vrot.slane %v891_v19, 1  ;;  %v903_v26 = vrot.slane %v891_v19, 2  ;;  %v1261_v19 = vld [vmem:[%s2149_s5] sm:$0xff] }
 0x127   : > { %1218 = vmatpush.msra.mxu1 %v1041_v17 }
 0x128   : > { %v898_v50 = vsel %vm895_vm0, %v896_v21, %v897_v22  ;;  %v904_v61 = vsel %vm901_vm1, %v902_v24, %v903_v26  ;;  %v1343_v22 = vld [vmem:[%s2151_s7 + $0x18] sm:$0xff] }
 0x129   : > { %1219 = vmatpush.msra.mxu1 %v1038_v20  ;;  %1090 = vmatmul.f32.vlgmr.msra.gmra.mxu2 %v898_v50  ;;  %v1277_v20 = vld [vmem:[%s2149_s5 + $0x80] sm:$0xff] }
 0x12a   : > { %1110 = vmatmul.f32.vlgmr.msra.gmra.mxu3 %v904_v61  ;;  %1150 = vmatmul.f32.vlgmr.msrb.gmra.mxu1 %v898_v50 }
 0x12b   : > { %1210 = vmatmul.f32.vlgmr.msra.gmra.mxu0 %v898_v50  ;;  %1220 = vmatpush.msra.mxu1 %v1035_v28  ;;  %v1249_v28 = vlaneseq }
 0x12c   : > { %1299 = vmatpush.msra.mxu2 %v1276_v41  ;;  %1319 = vmatpush.msra.mxu3 %v1292_v47  ;;  %v1340_v41 = vld [vmem:[%s2151_s7] sm:$0xff]  ;;  %v1373_v47 = vld [vmem:[%s2153_s9 + $0x18] sm:$0xff] }
 0x12d   : > { %1221 = vmatpush.msra.mxu1 %v1032_v30  ;;  %1361 = vmatpush.msrb.mxu0 %v1343_v22  ;;  %vm1251_vm2 = vcmp.lt.s32.totalorder %v1249_v28, 128 }
 0x12e   : > { %1300 = vmatpush.msra.mxu2 %v1275_v51  ;;  %1320 = vmatpush.msra.mxu3 %v1291_v3  ;;  %v1372_v51 = vld [vmem:[%s2153_s9 + $0x10] sm:$0xff]  ;;  %v1293_v3 = vld [vmem:[%s2150_s6] sm:$0x1] }
 0x12f   : > { %1222 = vmatpush.msra.mxu1 %v1029_v31 }
 0x130   : > { %1301 = vmatpush.msra.mxu2 %v1274_v60  ;;  %1321 = vmatpush.msra.mxu3 %v1290_v39 }
 0x131   : > { %1223 = vmatpush.msra.mxu1 %v1026_v32  ;;  %1170 = vmatmul.f32.vlgmr.msrb.gmra.mxu2 %v904_v61 }
 0x132   : > { %1190 = vmatmul.f32.vlgmr.msrb.gmra.mxu3 %v890_v9  ;;  %1302 = vmatpush.msra.mxu2 %v1273_v5 }
 0x133   : > { %1224 = vmatpush.msra.mxu1 %v1023_v33  ;;  %1322 = vmatpush.msra.mxu3 %v1289_v18 }
 0x134   : > { %1303 = vmatpush.msra.mxu2 %v1272_v42 }
 0x135   : > { %1225 = vmatpush.msra.mxu1 %v1020_v0  ;;  %1323 = vmatpush.msra.mxu3 %v1288_v63  ;;  %v1371_v63 = vld [vmem:[%s2153_s9 + $0x8] sm:$0xff] }
 0x136   : > { %1304 = vmatpush.msra.mxu2 %v1271_v44  ;;  %v1344_v44 = vld [vmem:[%s2152_s8] sm:$0x1] }
 0x137   : > { %1226 = vmatpush.msra.mxu1 %v1017_v35  ;;  %1324 = vmatpush.msra.mxu3 %v1287_v23 }
 0x138   : > { %1305 = vmatpush.msra.mxu2 %v1270_v52  ;;  %v1374_v52 = vld [vmem:[%s2154_s10] sm:$0x1] }
 0x139   : > { %1227 = vmatpush.msra.mxu1 %v1014_v36  ;;  %1325 = vmatpush.msra.mxu3 %v1286_v54 }
 0x13a   : > { %1306 = vmatpush.msra.mxu2 %v1269_v55 }
 0x13b   : > { %1228 = vmatpush.msra.mxu1 %v1011_v34  ;;  %1326 = vmatpush.msra.mxu3 %v1285_v25  ;;  %v1342_v34 = vld [vmem:[%s2151_s7 + $0x10] sm:$0xff] }
 0x13c   : > { %1307 = vmatpush.msra.mxu2 %v1268_v57  ;;  %1362 = vmatpush.msrb.mxu0 %v1342_v34 }
 0x13d   : > { %1229 = vmatpush.msra.mxu1 %v1008_v38  ;;  %1327 = vmatpush.msra.mxu3 %v1284_v58  ;;  %v1341_v38 = vld [vmem:[%s2151_s7 + $0x8] sm:$0xff] }
 0x13e   : > { %1230 = vmatmul.f32.vlgmr.msra.gmra.mxu1 %v904_v61  ;;  %1308 = vmatpush.msra.mxu2 %v1267_v15  ;;  %v1568_v61 = vld [vmem:[%s2148_s4] ss:$0 sm:$0xff] }
 0x13f   : > { %1328 = vmatpush.msra.mxu3 %v1283_v27  ;;  %1363 = vmatpush.msrb.mxu0 %v1341_v38 }
 0x140   : > { %1309 = vmatpush.msra.mxu2 %v1266_v59  ;;  %1390 = vmatpush.msrb.mxu1 %v1373_v47 }
 0x141   : > { %1329 = vmatpush.msra.mxu3 %v1282_v62  ;;  %1364 = vmatpush.msrb.mxu0 %v1340_v41 }
 0x142   : > { %1310 = vmatpush.msra.mxu2 %v1265_v4  ;;  %1391 = vmatpush.msrb.mxu1 %v1372_v51 }
 0x143   : > { %1330 = vmatpush.msra.mxu3 %v1281_v6 }
 0x144   : > { %1311 = vmatpush.msra.mxu2 %v1264_v46  ;;  %1392 = vmatpush.msrb.mxu1 %v1371_v63 }
 0x145   : > { %1331 = vmatpush.msra.mxu3 %v1280_v8 }
 0x146   : > { %1312 = vmatpush.msra.mxu2 %v1263_v49 }
 0x147   : > { %1332 = vmatpush.msra.mxu3 %v1279_v11 }
 0x148   : > { %1313 = vmatpush.msra.mxu2 %v1262_v40 }
 0x149   : > { %1333 = vmatpush.msra.mxu3 %v1278_v14 }
 0x14a   : > { %1314 = vmatpush.msra.mxu2 %v1261_v19 }
 0x14b   : > { %1334 = vmatpush.msra.mxu3 %v1277_v20 }
 0x19b   : > { %v1071_v53 = vpop.f32.mrf.mxu1  ;;  %v1131_v37 = vpop.f32.mrf.mxu0 }
 0x1a7   : > { %v1151_v43 = vpop.f32.mrf.mxu1 }
 0x1a8   : > { %v1152_v1 = vadd.f32 %v1151_v43, %v1131_v37  ;;  %v1211_v10 = vpop.f32.mrf.mxu0 }
 0x1ac   : > { %v1091_v45 = vpop.f32.mrf.mxu2 }
 0x1ad   : > { %v1111_v48 = vpop.f32.mrf.mxu3  ;;  %v1092_v7 = vadd.f32 %v1091_v45, %v1071_v53  ;;  %v1370_v53 = vld [vmem:[%s2153_s9] sm:$0xff] }
 0x1ae   : > { %1393 = vmatpush.msrb.mxu1 %v1370_v53 }
 0x1af   : > { %v1112_v12 = vadd.f32 %v1111_v48, %v1092_v7 }
 0x1b4   : > { %v1171_v2 = vpop.f32.mrf.mxu2 }
 0x1b5   : > { %v1191_v56 = vpop.f32.mrf.mxu3  ;;  %v1172_v9 = vadd.f32 %v1171_v2, %v1152_v1 }
 0x1b6   : > { %v1212_v13 = vadd.f32 %v1211_v10, %v1191_v56 }
 0x1b7   : > { %v1234_v16 = vmax.f32 %v1112_v12, %v1172_v9 }
 0x1bb   : > { %v1231_v29 = vpop.f32.mrf.mxu1 }
 0x1bc   : > { %v1232_v17 = vadd.f32 %v1231_v29, %v1212_v13 }
 0x1be   : > { %v1235_v21 = vmax.f32 %v1234_v16, %v1232_v17 }
 0x1c0   : > { %1236 = vst [vmem:[#allocation5] sm:$0xff] %v1235_v21 }
 0x1c7   : > { %v1237_v24 = vld [vmem:[#allocation5] ss:$3 sm:$0x3]  ;;  %v1239_v26 = vld [vmem:[#allocation5 + $0x1] ss:$3 sm:$0x3] }
 0x1c8   : > { %v1240_v50 = vmax.f32 %v1237_v24, %v1239_v26  ;;  %v1242_v30 = vld [vmem:[#allocation5 + $0x2] ss:$3 sm:$0x3] }
 0x1ca   : > { %v1243_v31 = vmax.f32 %v1240_v50, %v1242_v30 }
 0x1cc   : > { %v1248_v32 = vadd.f32 %v1568_v61, %v1243_v31 }
 0x1ce   : > { %1255 = vst [vmem:[#allocation1] sm:$0xff] %v1248_v32 }
 0x1cf   : > { %1253 = vst.msk [vmem:[#allocation6] sm:$0x1] %vm1251_vm2, %v1248_v32 }
 0x1d5   : > { %v1257_v33 = vld [vmem:[#allocation1 + $0x1] ss:$9 sm:$0xff] }
 0x1d6   : > { %1259 = vst.msk [vmem:[#allocation6 + $0x1] sm:$0x1] %vm1251_vm2, %v1257_v33 }
 0x1dd   : > { %v1260_v0 = vld [vmem:[#allocation6] sm:$0x3] }
 0x1de   : > { %v1295_v35 = vperm.slane %v1260_v0, 0  ;;  %v1296_v36 = vperm.slane %v1260_v0, 1 }
 0x1e0   : > { %1315 = vmatmul.f32.vlgmr.msra.gmra.mxu2 %v1295_v35  ;;  %1335 = vmatmul.f32.vlgmr.msra.gmra.mxu3 %v1296_v36 }
 0x263   : > { %v1316_v60 = vpop.f32.mrf.mxu2  ;;  %v1336_v5 = vpop.f32.mrf.mxu3 }
 0x264   : > { %v1317_v39 = vadd.f32 %v1316_v60, %v1293_v3 }
 0x266   : > { %v1337_v18 = vadd.f32 %v1336_v5, %v1317_v39 }
 0x268   : > { %v1339_v42 = vmax.f32 %v1337_v18, 0.0 }
 0x26a   : > { %1500 = vmatmul.msk.f32.vlgmr.msrb.gmra.mxu0 %vm1345_vm3, %v1339_v42 }
 0x2e7   : > { %v1366_v23 = vpop.f32.mrf.mxu0 }
 0x2e8   : > { %v1367_v45 = vadd.f32 %v1366_v23, %v1344_v44 }
 0x2ea   : > { %v1369_v48 = vmax.f32 %v1367_v45, 0.0 }
 0x2ec   : > { %1501 = vmatmul.msk.f32.vlgmr.msrb.gmra.mxu1 %vm1345_vm3, %v1369_v48 }
 0x369   : > { %v1395_v54 = vpop.f32.mrf.mxu1 }
 0x36a   : > { %v1396_v55 = vadd.f32 %v1395_v54, %v1374_v52 }
 0x36c   : > { %1399 = vst.msk [vmem:[%s412_s12] sm:$0x1] %vm1398_vm4, %v1396_v55 }
 0x36d   : > { %1656 = shalt.err (!%p1653_p8)
}
 0x36e   : > { %1513 = dma.vmem_to_hbm [thread:$0]  (%p1803_p5), %s1412_s13, 16, %s1414_s14, %s1401_s15  }
 0x36f PF: > { %p1530_p9 = scmp.ge.s32.totalorder %s1699_s20, 2  ;;  %s1425_s24 = sand.u32 1, %s1687_s17  }
 0x370   : > { %s1426_s29 = scalar_lea.sflag [#allocation9], %s1425_s24 }
 0x371   : > { %p1523_p10 = pnand %p1530_p9, %p1807_p6 }
 0x373   : > { %p1524_p11 = pneg %p1523_p10 }
 0x375   : > { %1682 = dma.done.wait (%p1524_p11), %s1426_s29, 16  }
 0x376   : > { %1684 = vsyncadd (%p1524_p11), %s1426_s29, 4294967280  ;;  %s2162_s12 = sld [smem:[#allocation16_spill]]  ;;  %p23_p12 = scmp.ge.s32.totalorder %s1790_s23, 4  }
 0x377   : > { %s2163_s19 = sld [smem:[#allocation17_spill]]  ;;  %s2164_s17 = smov %s1691_s18 }
 0x378   : > { %s2166_s20 = smov %s1790_s23  ;;  %25 = sbr.rel (!%p23_p12) target bundleno = 5 (0x5), region = 116 }
 0x37c   : > { %s2165_s18 = smov %s2162_s12 }
 0x37d   :  { %1431 = vsyncpa [#allocation8], 1 }
 0x37e   :  { %1433 = vsyncpa [#allocation8 + $0x1], 1 }
 0x37f   :  { %1434 = vsyncpa [#allocation11], 1 }
 0x380   :  { %1435 = vsyncpa [#allocation9], 1 }
 0x381   :  { %1437 = vsyncpa [#allocation9 + $0x1], 1 }

</bundles_post_ra>
